<compile_context>
chip_gen: v5e
topology: v5e:2x2
jax: 0.10.0
libtpu: 0.0.40
codegen_flags: <defaults>
</compile_context>

<pallas_src>
import numpy as np
import jax
import jax.numpy as jnp
from jax import lax
from jax.experimental import pallas as pl
from jax.experimental.pallas import tpu as pltpu

CONV_OUT = 3
KH = KW = 3
H_IN = W_IN = 15
H_OUT = W_OUT = 13                    # 15 - 3 + 1
HW_IN = H_IN * W_IN                   # 225  (flattened board, contraction dim)
HW_OUT = H_OUT * W_OUT                # 169
FC_IN = CONV_OUT * HW_OUT             # 507
FC_OUT = 225
FC_IN_PAD = 512                       # activation width 507 -> 512 (lane-dense)
FC_OUT_PAD = 256                      # output width 225 -> 256 (lane-dense store)
BN_EPS = 1e-5


def dqn_fused_kernel(x_ref, wlift_ref, fcw_ref, fcb_ref, gamma_ref, beta_ref, o_ref):
    """x_ref: (B, 225) f32 VMEM; wlift_ref: (225, 512) bf16 VMEM;
    fcw_ref: (512, 256) bf16 VMEM; fcb_ref: (1, 256) f32 VMEM;
    gamma/beta: (3,) f32 SMEM; o_ref: (B, 256) f32 VMEM."""
    B = x_ref.shape[0]

    # Lifted 3x3 "valid" conv on the MXU: flattened-input @ lifted-weight -> (B, 512).
    # Columns [0, 507) hold the conv output in torch (C, H, W) flatten order; the
    # rest are exactly zero.  bf16 operands, f32 accumulation.
    xb = x_ref[...].astype(jnp.bfloat16)
    conv = jnp.dot(xb, wlift_ref[...], preferred_element_type=jnp.float32)  # (B,512) f32

    # BatchNorm2d with training-mode batch statistics (biased variance) per channel.
    # Column-reduce first (one pass over the (B,512) slab), then three masked
    # lane-reductions on the (1,512) rows.  One-pass E[x^2]-E[x]^2 is fine here:
    # conv outputs have no large common offset (bias dropped, inputs in [0,1)).
    colsum = jnp.sum(conv, axis=0, keepdims=True)            # (1, 512)
    colsumsq = jnp.sum(conv * conv, axis=0, keepdims=True)   # (1, 512)

    col = lax.broadcasted_iota(jnp.int32, (1, FC_IN_PAD), 1)
    scale = jnp.zeros((1, FC_IN_PAD), jnp.float32)
    shift = jnp.zeros((1, FC_IN_PAD), jnp.float32)
    inv_n = 1.0 / float(B * HW_OUT)
    for c in range(CONV_OUT):
        in_ch = (col >= c * HW_OUT) & (col < (c + 1) * HW_OUT)      # (1, 512)
        s = jnp.sum(jnp.where(in_ch, colsum, 0.0))
        ss = jnp.sum(jnp.where(in_ch, colsumsq, 0.0))
        mean = s * inv_n
        var = ss * inv_n - mean * mean
        g = gamma_ref[c] * lax.rsqrt(var + BN_EPS)
        scale = jnp.where(in_ch, g, scale)
        shift = jnp.where(in_ch, beta_ref[c] - mean * g, shift)

    # Normalize + ReLU in one lane-dense pass (padded columns stay exactly zero).
    act = jnp.maximum(conv * scale + shift, 0.0)                     # (B, 512) f32

    # FC on the MXU with pre-transposed, padded bf16 weight; 256-wide lane-dense store.
    o_ref[...] = (
        jnp.dot(act.astype(jnp.bfloat16), fcw_ref[...],
                preferred_element_type=jnp.float32)
        + fcb_ref[...]
    )


def init_params(key):
    """Deterministic synthetic parameters matching the PyTorch module's shapes."""
    k1, k2, k3, k4 = jax.random.split(key, 4)
    conv_bound = 1.0 / np.sqrt(1.0 * KH * KW)        # fan_in = 1*3*3
    fc_bound = 1.0 / np.sqrt(float(FC_IN))           # fan_in = 507
    conv_w = jax.random.uniform(k1, (CONV_OUT, 1, KH, KW), jnp.float32,
                                -conv_bound, conv_bound)
    conv_b = jax.random.uniform(k2, (CONV_OUT,), jnp.float32,
                                -conv_bound, conv_bound)
    fc_w = jax.random.uniform(k3, (FC_OUT, FC_IN), jnp.float32,
                              -fc_bound, fc_bound)   # torch Linear: (out, in)
    fc_b = jax.random.uniform(k4, (FC_OUT,), jnp.float32,
                              -fc_bound, fc_bound)
    gamma = jnp.ones((CONV_OUT,), jnp.float32)
    beta = jnp.zeros((CONV_OUT,), jnp.float32)
    return dict(conv_w=conv_w, conv_b=conv_b, gamma=gamma, beta=beta,
                fc_w=fc_w, fc_b=fc_b)


def prepare_params(params):
    """Host-side (one-time) repacking into kernel-friendly bf16 layouts."""
    cw = np.asarray(params["conv_w"], np.float32)            # (3, 1, 3, 3)

    # Lifted conv weight: (flattened 15x15 input, 225) -> (flattened (C,13,13) output,
    # zero-padded to 512).  Conv bias is intentionally dropped (no-op under training BN).
    w_lift = np.zeros((HW_IN, FC_IN_PAD), np.float32)
    jo = np.arange(W_OUT)
    for c in range(CONV_OUT):
        for di in range(KH):
            for dj in range(KW):
                w = cw[c, 0, di, dj]
                for io in range(H_OUT):
                    rows = (io + di) * W_IN + (jo + dj)
                    cols = c * HW_OUT + io * W_OUT + jo
                    w_lift[rows, cols] += w

    fw = np.asarray(params["fc_w"], np.float32)              # (225, 507)
    fc_w_pad = np.zeros((FC_IN_PAD, FC_OUT_PAD), np.float32)
    fc_w_pad[:FC_IN, :FC_OUT] = fw.T
    fc_b_pad = np.zeros((1, FC_OUT_PAD), np.float32)
    fc_b_pad[0, :FC_OUT] = np.asarray(params["fc_b"], np.float32)

    return dict(w_lift=jnp.asarray(w_lift, dtype=jnp.bfloat16),
                fc_w_pad=jnp.asarray(fc_w_pad, dtype=jnp.bfloat16),
                fc_b_pad=jnp.asarray(fc_b_pad),
                gamma=params["gamma"],
                beta=params["beta"])


def dqn_forward(x, prep):
    """x: (B, 1, 15, 15) NCHW float32 (or already-flat (B, 225)) -> (B, 225) float32."""
    if x.ndim == 4:
        # TODO(synk): store replay-buffer states pre-flattened to skip this reshape.
        x = x.reshape(x.shape[0], HW_IN)
    B = x.shape[0]

    flops = 2 * B * (HW_IN * FC_IN_PAD + FC_IN_PAD * FC_OUT_PAD)
    bytes_accessed = ((HW_IN * FC_IN_PAD + FC_IN_PAD * FC_OUT_PAD) * 2   # bf16 weights
                      + B * (HW_IN + FC_OUT_PAD) * 4                      # x in, out
                      + FC_OUT_PAD * 4 + 2 * CONV_OUT * 4)                # bias, bn

    out_pad = pl.pallas_call(
        dqn_fused_kernel,
        out_shape=jax.ShapeDtypeStruct((B, FC_OUT_PAD), jnp.float32),
        in_specs=[
            pl.BlockSpec(memory_space=pltpu.MemorySpace.VMEM),   # x (B, 225) f32
            pl.BlockSpec(memory_space=pltpu.MemorySpace.VMEM),   # lifted conv W (225, 512) bf16
            pl.BlockSpec(memory_space=pltpu.MemorySpace.VMEM),   # fc W^T padded (512, 256) bf16
            pl.BlockSpec(memory_space=pltpu.MemorySpace.VMEM),   # fc bias (1, 256) f32
            pl.BlockSpec(memory_space=pltpu.MemorySpace.SMEM),   # bn gamma (3,)
            pl.BlockSpec(memory_space=pltpu.MemorySpace.SMEM),   # bn beta (3,)
        ],
        out_specs=pl.BlockSpec(memory_space=pltpu.MemorySpace.VMEM),
        cost_estimate=pl.CostEstimate(flops=flops, transcendentals=0,
                                      bytes_accessed=bytes_accessed),
    )(x, prep["w_lift"], prep["fc_w_pad"], prep["fc_b_pad"],
      prep["gamma"], prep["beta"])

    # Slice back to the module's 225-wide output.  Downstream code that can consume
    # the lane-dense 256-wide slab should take out_pad directly and skip this copy.
    return out_pad[:, :FC_OUT]


def reference_forward(x, params):
    """Pure-JAX reference of the PyTorch forward (training-mode BN)."""
    conv = lax.conv_general_dilated(
        x, params["conv_w"], (1, 1), "VALID",
        dimension_numbers=("NCHW", "OIHW", "NCHW"),
        precision=lax.Precision.HIGHEST)
    conv = conv + params["conv_b"][None, :, None, None]
    mean = conv.mean(axis=(0, 2, 3), keepdims=True)
    var = ((conv - mean) ** 2).mean(axis=(0, 2, 3), keepdims=True)
    h = (conv - mean) * lax.rsqrt(var + BN_EPS)
    h = h * params["gamma"][None, :, None, None] + params["beta"][None, :, None, None]
    h = jnp.maximum(h, 0.0)
    hf = h.reshape(x.shape[0], -1)
    return (jnp.dot(hf, params["fc_w"].T, precision=lax.Precision.HIGHEST)
            + params["fc_b"])


if __name__ == "__main__":
    key = jax.random.PRNGKey(0)
    k_param, k_input = jax.random.split(key)
    params = init_params(k_param)
    prep = prepare_params(params)

    # Board-like input matching the module's documented shape (batch, 1, 15, 15).
    x = jax.random.uniform(k_input, (2, 1, 15, 15), jnp.float32)

    out = jax.jit(dqn_forward)(x, prep)
    out = jax.block_until_ready(out)

    assert out.shape == (2, FC_OUT) and out.dtype == jnp.float32
    ref = reference_forward(x, params)
    max_err = float(jnp.max(jnp.abs(out - ref)))
    assert max_err < 5e-2, f"mismatch vs reference: max |diff| = {max_err}"
    print("KERNEL_OK")
</pallas_src>

<mosaic_0001>
module attributes {stable_mosaic.version = 11 : i64} {
  func.func @dqn_fused_kernel(%arg0: memref<2x225xf32, #tpu.memory_space<vmem>>, %arg1: memref<225x512xbf16, #tpu.memory_space<vmem>>, %arg2: memref<512x256xbf16, #tpu.memory_space<vmem>>, %arg3: memref<1x256xf32, #tpu.memory_space<vmem>>, %arg4: memref<3xf32, #tpu.memory_space<smem>>, %arg5: memref<3xf32, #tpu.memory_space<smem>>, %arg6: memref<2x256xf32, #tpu.memory_space<vmem>>) attributes {dimension_semantics = [], scalar_prefetch = 0 : i64, scratch_operands = 0 : i64, tpu.core_type = #tpu.core_type<tc>} {
    %c0 = arith.constant 0 : index
    %c0_0 = arith.constant 0 : index
    %0 = vector.load %arg0[%c0, %c0_0] : memref<2x225xf32, #tpu.memory_space<vmem>>, vector<2x225xf32>
    %1 = arith.truncf %0 : vector<2x225xf32> to vector<2x225xbf16>
    %c0_1 = arith.constant 0 : index
    %c0_2 = arith.constant 0 : index
    %2 = vector.load %arg1[%c0_1, %c0_2] : memref<225x512xbf16, #tpu.memory_space<vmem>>, vector<225x512xbf16>
    %cst = arith.constant dense<0.000000e+00> : vector<2x512xf32>
    %3 = tpu.matmul %1, %2, %cst {dimension_numbers = #tpu.dot_dimension_numbers<[1], [0], [0], [1], [0, 0, 1, 1], [], []>} : vector<2x225xbf16>, vector<225x512xbf16>, vector<2x512xf32> -> vector<2x512xf32>
    %cst_3 = arith.constant dense<0.000000e+00> : vector<512xf32>
    %4 = vector.multi_reduction <add>, %3, %cst_3 [0] : vector<2x512xf32> to vector<512xf32>
    %5 = vector.shape_cast %4 : vector<512xf32> to vector<1x512xf32>
    %6 = arith.mulf %3, %3 : vector<2x512xf32>
    %cst_4 = arith.constant dense<0.000000e+00> : vector<512xf32>
    %7 = vector.multi_reduction <add>, %6, %cst_4 [0] : vector<2x512xf32> to vector<512xf32>
    %8 = vector.shape_cast %7 : vector<512xf32> to vector<1x512xf32>
    %9 = tpu.iota {dimensions = array<i32: 1>} : vector<1x512xi32>
    %cst_5 = arith.constant 0.000000e+00 : f32
    %10 = vector.broadcast %cst_5 : f32 to vector<1x512xf32>
    %cst_6 = arith.constant 0.000000e+00 : f32
    %11 = vector.broadcast %cst_6 : f32 to vector<1x512xf32>
    %c0_i32 = arith.constant 0 : i32
    %12 = vector.broadcast %c0_i32 : i32 to vector<1x512xi32>
    %13 = arith.cmpi sge, %9, %12 : vector<1x512xi32>
    %c169_i32 = arith.constant 169 : i32
    %14 = vector.broadcast %c169_i32 : i32 to vector<1x512xi32>
    %15 = arith.cmpi slt, %9, %14 : vector<1x512xi32>
    %16 = arith.andi %13, %15 : vector<1x512xi1>
    %cst_7 = arith.constant 0.000000e+00 : f32
    %17 = vector.broadcast %cst_7 : f32 to vector<1x512xf32>
    %18 = arith.select %16, %5, %17 : vector<1x512xi1>, vector<1x512xf32>
    %19 = vector.shape_cast %18 : vector<1x512xf32> to vector<1x1x512xf32>
    %cst_8 = arith.constant dense<0.000000e+00> : vector<1xf32>
    %20 = vector.multi_reduction <add>, %19, %cst_8 [1, 2] : vector<1x1x512xf32> to vector<1xf32>
    %21 = vector.shape_cast %20 : vector<1xf32> to vector<1x1x1xf32>
    %22 = vector.extract %21[0, 0, 0] : f32 from vector<1x1x1xf32>
    %cst_9 = arith.constant 0.000000e+00 : f32
    %23 = vector.broadcast %cst_9 : f32 to vector<1x512xf32>
    %24 = arith.select %16, %8, %23 : vector<1x512xi1>, vector<1x512xf32>
    %25 = vector.shape_cast %24 : vector<1x512xf32> to vector<1x1x512xf32>
    %cst_10 = arith.constant dense<0.000000e+00> : vector<1xf32>
    %26 = vector.multi_reduction <add>, %25, %cst_10 [1, 2] : vector<1x1x512xf32> to vector<1xf32>
    %27 = vector.shape_cast %26 : vector<1xf32> to vector<1x1x1xf32>
    %28 = vector.extract %27[0, 0, 0] : f32 from vector<1x1x1xf32>
    %cst_11 = arith.constant 2.958580e-03 : f32
    %29 = arith.mulf %22, %cst_11 : f32
    %cst_12 = arith.constant 2.958580e-03 : f32
    %30 = arith.mulf %28, %cst_12 : f32
    %31 = arith.mulf %29, %29 : f32
    %32 = arith.subf %30, %31 : f32
    %c0_13 = arith.constant 0 : index
    %33 = memref.load %arg4[%c0_13] : memref<3xf32, #tpu.memory_space<smem>>
    %cst_14 = arith.constant 9.99999974E-6 : f32
    %34 = arith.addf %32, %cst_14 : f32
    %35 = math.rsqrt %34 : f32
    %36 = arith.mulf %33, %35 : f32
    %37 = vector.broadcast %36 : f32 to vector<1x512xf32>
    %38 = arith.select %16, %37, %10 : vector<1x512xi1>, vector<1x512xf32>
    %c0_15 = arith.constant 0 : index
    %39 = memref.load %arg5[%c0_15] : memref<3xf32, #tpu.memory_space<smem>>
    %40 = arith.mulf %29, %36 : f32
    %41 = arith.subf %39, %40 : f32
    %42 = vector.broadcast %41 : f32 to vector<1x512xf32>
    %43 = arith.select %16, %42, %11 : vector<1x512xi1>, vector<1x512xf32>
    %c169_i32_16 = arith.constant 169 : i32
    %44 = vector.broadcast %c169_i32_16 : i32 to vector<1x512xi32>
    %45 = arith.cmpi sge, %9, %44 : vector<1x512xi32>
    %c338_i32 = arith.constant 338 : i32
    %46 = vector.broadcast %c338_i32 : i32 to vector<1x512xi32>
    %47 = arith.cmpi slt, %9, %46 : vector<1x512xi32>
    %48 = arith.andi %45, %47 : vector<1x512xi1>
    %cst_17 = arith.constant 0.000000e+00 : f32
    %49 = vector.broadcast %cst_17 : f32 to vector<1x512xf32>
    %50 = arith.select %48, %5, %49 : vector<1x512xi1>, vector<1x512xf32>
    %51 = vector.shape_cast %50 : vector<1x512xf32> to vector<1x1x512xf32>
    %cst_18 = arith.constant dense<0.000000e+00> : vector<1xf32>
    %52 = vector.multi_reduction <add>, %51, %cst_18 [1, 2] : vector<1x1x512xf32> to vector<1xf32>
    %53 = vector.shape_cast %52 : vector<1xf32> to vector<1x1x1xf32>
    %54 = vector.extract %53[0, 0, 0] : f32 from vector<1x1x1xf32>
    %cst_19 = arith.constant 0.000000e+00 : f32
    %55 = vector.broadcast %cst_19 : f32 to vector<1x512xf32>
    %56 = arith.select %48, %8, %55 : vector<1x512xi1>, vector<1x512xf32>
    %57 = vector.shape_cast %56 : vector<1x512xf32> to vector<1x1x512xf32>
    %cst_20 = arith.constant dense<0.000000e+00> : vector<1xf32>
    %58 = vector.multi_reduction <add>, %57, %cst_20 [1, 2] : vector<1x1x512xf32> to vector<1xf32>
    %59 = vector.shape_cast %58 : vector<1xf32> to vector<1x1x1xf32>
    %60 = vector.extract %59[0, 0, 0] : f32 from vector<1x1x1xf32>
    %cst_21 = arith.constant 2.958580e-03 : f32
    %61 = arith.mulf %54, %cst_21 : f32
    %cst_22 = arith.constant 2.958580e-03 : f32
    %62 = arith.mulf %60, %cst_22 : f32
    %63 = arith.mulf %61, %61 : f32
    %64 = arith.subf %62, %63 : f32
    %c1 = arith.constant 1 : index
    %65 = memref.load %arg4[%c1] : memref<3xf32, #tpu.memory_space<smem>>
    %cst_23 = arith.constant 9.99999974E-6 : f32
    %66 = arith.addf %64, %cst_23 : f32
    %67 = math.rsqrt %66 : f32
    %68 = arith.mulf %65, %67 : f32
    %69 = vector.broadcast %68 : f32 to vector<1x512xf32>
    %70 = arith.select %48, %69, %38 : vector<1x512xi1>, vector<1x512xf32>
    %c1_24 = arith.constant 1 : index
    %71 = memref.load %arg5[%c1_24] : memref<3xf32, #tpu.memory_space<smem>>
    %72 = arith.mulf %61, %68 : f32
    %73 = arith.subf %71, %72 : f32
    %74 = vector.broadcast %73 : f32 to vector<1x512xf32>
    %75 = arith.select %48, %74, %43 : vector<1x512xi1>, vector<1x512xf32>
    %c338_i32_25 = arith.constant 338 : i32
    %76 = vector.broadcast %c338_i32_25 : i32 to vector<1x512xi32>
    %77 = arith.cmpi sge, %9, %76 : vector<1x512xi32>
    %c507_i32 = arith.constant 507 : i32
    %78 = vector.broadcast %c507_i32 : i32 to vector<1x512xi32>
    %79 = arith.cmpi slt, %9, %78 : vector<1x512xi32>
    %80 = arith.andi %77, %79 : vector<1x512xi1>
    %cst_26 = arith.constant 0.000000e+00 : f32
    %81 = vector.broadcast %cst_26 : f32 to vector<1x512xf32>
    %82 = arith.select %80, %5, %81 : vector<1x512xi1>, vector<1x512xf32>
    %83 = vector.shape_cast %82 : vector<1x512xf32> to vector<1x1x512xf32>
    %cst_27 = arith.constant dense<0.000000e+00> : vector<1xf32>
    %84 = vector.multi_reduction <add>, %83, %cst_27 [1, 2] : vector<1x1x512xf32> to vector<1xf32>
    %85 = vector.shape_cast %84 : vector<1xf32> to vector<1x1x1xf32>
    %86 = vector.extract %85[0, 0, 0] : f32 from vector<1x1x1xf32>
    %cst_28 = arith.constant 0.000000e+00 : f32
    %87 = vector.broadcast %cst_28 : f32 to vector<1x512xf32>
    %88 = arith.select %80, %8, %87 : vector<1x512xi1>, vector<1x512xf32>
    %89 = vector.shape_cast %88 : vector<1x512xf32> to vector<1x1x512xf32>
    %cst_29 = arith.constant dense<0.000000e+00> : vector<1xf32>
    %90 = vector.multi_reduction <add>, %89, %cst_29 [1, 2] : vector<1x1x512xf32> to vector<1xf32>
    %91 = vector.shape_cast %90 : vector<1xf32> to vector<1x1x1xf32>
    %92 = vector.extract %91[0, 0, 0] : f32 from vector<1x1x1xf32>
    %cst_30 = arith.constant 2.958580e-03 : f32
    %93 = arith.mulf %86, %cst_30 : f32
    %cst_31 = arith.constant 2.958580e-03 : f32
    %94 = arith.mulf %92, %cst_31 : f32
    %95 = arith.mulf %93, %93 : f32
    %96 = arith.subf %94, %95 : f32
    %c2 = arith.constant 2 : index
    %97 = memref.load %arg4[%c2] : memref<3xf32, #tpu.memory_space<smem>>
    %cst_32 = arith.constant 9.99999974E-6 : f32
    %98 = arith.addf %96, %cst_32 : f32
    %99 = math.rsqrt %98 : f32
    %100 = arith.mulf %97, %99 : f32
    %101 = vector.broadcast %100 : f32 to vector<1x512xf32>
    %102 = arith.select %80, %101, %70 : vector<1x512xi1>, vector<1x512xf32>
    %c2_33 = arith.constant 2 : index
    %103 = memref.load %arg5[%c2_33] : memref<3xf32, #tpu.memory_space<smem>>
    %104 = arith.mulf %93, %100 : f32
    %105 = arith.subf %103, %104 : f32
    %106 = vector.broadcast %105 : f32 to vector<1x512xf32>
    %107 = arith.select %80, %106, %75 : vector<1x512xi1>, vector<1x512xf32>
    %108 = vector.broadcast %102 : vector<1x512xf32> to vector<2x512xf32>
    %109 = arith.mulf %3, %108 : vector<2x512xf32>
    %110 = vector.broadcast %107 : vector<1x512xf32> to vector<2x512xf32>
    %111 = arith.addf %109, %110 : vector<2x512xf32>
    %cst_34 = arith.constant 0.000000e+00 : f32
    %112 = vector.broadcast %cst_34 : f32 to vector<2x512xf32>
    %113 = arith.maximumf %111, %112 : vector<2x512xf32>
    %114 = arith.truncf %113 : vector<2x512xf32> to vector<2x512xbf16>
    %c0_35 = arith.constant 0 : index
    %c0_36 = arith.constant 0 : index
    %115 = vector.load %arg2[%c0_35, %c0_36] : memref<512x256xbf16, #tpu.memory_space<vmem>>, vector<512x256xbf16>
    %cst_37 = arith.constant dense<0.000000e+00> : vector<2x256xf32>
    %116 = tpu.matmul %114, %115, %cst_37 {dimension_numbers = #tpu.dot_dimension_numbers<[1], [0], [0], [1], [0, 0, 1, 1], [], []>} : vector<2x512xbf16>, vector<512x256xbf16>, vector<2x256xf32> -> vector<2x256xf32>
    %c0_38 = arith.constant 0 : index
    %c0_39 = arith.constant 0 : index
    %117 = vector.load %arg3[%c0_38, %c0_39] : memref<1x256xf32, #tpu.memory_space<vmem>>, vector<1x256xf32>
    %118 = vector.broadcast %117 : vector<1x256xf32> to vector<2x256xf32>
    %119 = arith.addf %116, %118 : vector<2x256xf32>
    %c0_40 = arith.constant 0 : index
    %c0_41 = arith.constant 0 : index
    %120 = vector.load %arg6[%c0_40, %c0_41] : memref<2x256xf32, #tpu.memory_space<vmem>>, vector<2x256xf32>
    tpu.vector_store %arg6[%c0_40, %c0_41], %119 {strides = array<i32>} : memref<2x256xf32, #tpu.memory_space<vmem>>, vector<2x256xf32>,
    return
  }
}

</mosaic_0001>

<bundles_post_ra>
// kernel: dqn_forward.1
= control target key start
LH: loop header
LB: loop body
LE: loop exit
PB: predicated region body
PF: predicated region fallthrough
CT: control target
= control target key end

     0   :  { %11 = vsyncpa [#allocation3], 0  ;;  %s2406_s0 = inlined_call_operand.vmem [shape: f32[2,225], index: 0, kind: input, shape index: {}]   ;;  %s2407_s1 = inlined_call_operand.hbm [shape: bf16[225,512], index: 1, kind: input, shape index: {}]   ;;  %s2408_s2 = inlined_call_operand.hbm [shape: bf16[512,256], index: 2, kind: input, shape index: {}]   ;;  %s2409_s3 = inlined_call_operand.vmem [shape: f32[1,256], index: 3, kind: input, shape index: {}]   ;;  %s2410_s4 = inlined_call_operand.vmem [shape: f32[3], index: 4, kind: input, shape index: {}]   ;;  %s2411_s5 = inlined_call_operand.vmem [shape: f32[3], index: 5, kind: input, shape index: {}]   ;;  %s2412_s6 = inlined_call_operand.hbm [shape: f32[2,256], index: 6, kind: output, shape index: {}]  }
   0x1   :  { %12 = vsyncpa [#allocation7], 0 }
   0x2   :  { %13 = vsyncpa [#allocation5], 0 }
   0x3   :  { %14 = vsyncpa [#allocation10], 0 }
   0x4   :  { %15 = vsyncpa [#allocation4], 0  ;;  %s22_s23 = sshll.u32 %s2407_s1, 4  ;;  %s2164_s24 = smov [#allocation2]   ;;  %s23_s23 = int_to_ptr.hbm [resolvable:$true] %s22_s23 }
   0x5   :  { %s24_s25 = sshll.u32 %s2164_s24, 4  ;;  %s35_s28 = sshll.u32 %s2408_s2, 4  ;;  %s25_s25 = int_to_ptr.vmem [resolvable:$true] %s24_s25  ;;  %s36_s28 = int_to_ptr.hbm [resolvable:$true] %s35_s28 }
   0x6   :  { %s2165_s29 = smov 256   ;;  %s2166_s30 = smov 16  }
   0x7   :  { %30 = dma.hbm_to_vmem [thread:$0]  %s23_s23, 7424, %s25_s25, [#allocation3], %s2165_s29, %s2165_s29, %s2166_s30  }
   0x8   :  { %s2167_s7 = smov [#allocation6]   ;;  %s2168_s9 = smov 128  }
   0x9   :  { %s37_s8 = sshll.u32 %s2167_s7, 4  ;;  %s2169_s10 = smov 8   ;;  %s38_s8 = int_to_ptr.vmem [resolvable:$true] %s37_s8 }
   0xa   :  { %43 = dma.hbm_to_vmem [thread:$0]  %s36_s28, 8192, %s38_s8, [#allocation7], %s2168_s9, %s2168_s9, %s2169_s10  }
   0xb   :  { %s51_s12 = sshll.u32 %s2410_s4, 4  ;;  %s60_s15 = sshll.u32 %s2411_s5, 4  ;;  %s52_s12 = int_to_ptr.vmem [resolvable:$true] %s51_s12  ;;  %s61_s15 = int_to_ptr.vmem [resolvable:$true] %s60_s15 }
   0xc   :  { %s2170_s2 = smov [#allocation8]   ;;  %s2171_s16 = smov [#allocation9]  }
   0xd   :  { %54 = dma.vmem_to_smem %s52_s12, 16, %s2170_s2, [#allocation5]  }
   0xe   :  { %63 = dma.vmem_to_smem %s61_s15, 16, %s2171_s16, [#allocation10]  }
   0xf   :  { %2154 = dma.done.wait [#allocation3], 7424  }
  0x10   :  { %2155 = vsyncadd [#allocation3], 4294959872 }
  0x11   :  { %2156 = dma.done.wait [#allocation7], 8192  }
  0x12   :  { %2157 = vsyncadd [#allocation7], 4294959104 }
  0x13   :  { %2158 = dma.done.wait [#allocation5], 16  }
  0x14   :  { %2159 = vsyncadd [#allocation5], 4294967280 }
  0x15   :  { %2160 = dma.done.wait [#allocation10], 16  }
  0x16   :  { %2161 = vsyncadd [#allocation10], 4294967280 }
  0x17   :  { %80 = sfence }
  0x18   :  { %v1530_v0 = vld [vmem:[#allocation2 + $0xe0] sm:$0xf]  ;;  %v1934_v1 = vld [vmem:[#allocation2 + $0xec] sm:$0xf0]  ;;  %v1932_v2 = vld [vmem:[#allocation2 + $0xe4] sm:$0xf] }
  0x19   :  { %v1531_v3 = vor.u32 %v1934_v1, %v1530_v0  ;;  %v1532_v4 = vld [vmem:[#allocation2 + $0xf0] sm:$0xf0]  ;;  %v1514_v5 = vld [vmem:[#allocation2 + $0xc0] sm:$0xf]  ;;  %v1930_v6 = vld [vmem:[#allocation2 + $0xcc] sm:$0xf0] }
  0x1a   :  { %v1535_v7 = vor.u32 %v1932_v2, %v1532_v4  ;;  %v147_v8 = vld [vmem:[#allocation2 + $0x1c0] sm:$0x11]  ;;  %vm443_vm0 = vcmask 1040384   ;;  %v1515_v10 = vor.u32 %v1930_v6, %v1514_v5  ;;  %v1516_v12 = vld [vmem:[#allocation2 + $0xd0] sm:$0xf0]  ;;  %v2172_v14 = vmov 0  }
  0x1b   :  { %v1928_v9 = vld [vmem:[#allocation2 + $0xc4] sm:$0xf]  ;;  %458 = vmatpush.bf16.msra.mxu0 %v1531_v3  ;;  %v319_v11 = vunpack.c.l.b16 %v147_v8  ;;  %v320_v13 = vunpack.c.h.b16 %v147_v8  ;;  %v2222_v15 = vsel %vm443_vm0, 65535, %v2172_v14  ;;  %v1498_v17 = vld [vmem:[#allocation2 + $0xa0] sm:$0xf]  ;;  %vm439_vm1 = vcmask 793600  }
  0x1c   :  { %484 = vmatpush.bf16.msra.mxu2 %v1535_v7  ;;  %v1519_v16 = vor.u32 %v1928_v9, %v1516_v12  ;;  %v1926_v18 = vld [vmem:[#allocation2 + $0xac] sm:$0xf0]  ;;  %v1626_v21 = vld [vmem:[#allocation2 + $0x1a0] sm:$0xf]  ;;  %v1924_v22 = vld [vmem:[#allocation2 + $0xa4] sm:$0xf] }
  0x1d   :  { %v379_v19 = vpack.c.b16 %v319_v11, %v319_v11  ;;  %v380_v20 = vpack.c.b16 %v320_v13, %v320_v13  ;;  %v1500_v23 = vld [vmem:[#allocation2 + $0xb0] sm:$0xf0]  ;;  %v1958_v24 = vld [vmem:[#allocation2 + $0x1ac] sm:$0xf0]  ;;  %v1956_v25 = vld [vmem:[#allocation2 + $0x1a4] sm:$0xf]  ;;  %v1499_v29 = vor.u32 %v1926_v18, %v1498_v17 }
  0x1e   :  { %v1628_v26 = vld [vmem:[#allocation2 + $0x1b0] sm:$0xf0]  ;;  %v1503_v30 = vor.u32 %v1924_v22, %v1500_v23  ;;  %v1482_v31 = vld [vmem:[#allocation2 + $0x80] sm:$0xf]  ;;  %v1922_v32 = vld [vmem:[#allocation2 + $0x8c] sm:$0xf0]  ;;  %v1627_v33 = vor.u32 %v1958_v24, %v1626_v21 }
  0x1f   :  { %459 = vmatpush.bf16.msra.mxu0 %v1515_v10  ;;  %v447_v27 = vand.u32 %v2222_v15, %v379_v19  ;;  %v450_v28 = vand.u32 %v2222_v15, %v380_v20  ;;  %v1631_v34 = vor.u32 %v1956_v25, %v1628_v26  ;;  %v1610_v35 = vld [vmem:[#allocation2 + $0x180] sm:$0xf]  ;;  %v1920_v36 = vld [vmem:[#allocation2 + $0x84] sm:$0xf]  ;;  %v1484_v37 = vld [vmem:[#allocation2 + $0x90] sm:$0xf0]  ;;  %v1483_v41 = vor.u32 %v1922_v32, %v1482_v31 }
  0x20   :  { %485 = vmatpush.bf16.msra.mxu2 %v1519_v16  ;;  %v1954_v38 = vld [vmem:[#allocation2 + $0x18c] sm:$0xf0]  ;;  %v1952_v39 = vld [vmem:[#allocation2 + $0x184] sm:$0xf]  ;;  %v1612_v40 = vld [vmem:[#allocation2 + $0x190] sm:$0xf0]  ;;  %v1487_v42 = vor.u32 %v1920_v36, %v1484_v37 }
  0x21   :  { %472 = vmatpush.bf16.msra.mxu1 %v447_v27  ;;  %498 = vmatpush.bf16.msra.mxu3 %v450_v28  ;;  %v1466_v43 = vld [vmem:[#allocation2 + $0x60] sm:$0xf]  ;;  %v1918_v44 = vld [vmem:[#allocation2 + $0x6c] sm:$0xf0]  ;;  %v1611_v45 = vor.u32 %v1954_v38, %v1610_v35  ;;  %v1615_v46 = vor.u32 %v1952_v39, %v1612_v40  ;;  %v1916_v48 = vld [vmem:[#allocation2 + $0x64] sm:$0xf] }
  0x22   :  { %v1594_v47 = vld [vmem:[#allocation2 + $0x160] sm:$0xf]  ;;  %v1468_v49 = vld [vmem:[#allocation2 + $0x70] sm:$0xf0]  ;;  %v1950_v50 = vld [vmem:[#allocation2 + $0x16c] sm:$0xf0]  ;;  %v1467_v53 = vor.u32 %v1918_v44, %v1466_v43 }
  0x23   :  { %460 = vmatpush.bf16.msra.mxu0 %v1499_v29  ;;  %v1948_v51 = vld [vmem:[#allocation2 + $0x164] sm:$0xf]  ;;  %v1596_v52 = vld [vmem:[#allocation2 + $0x170] sm:$0xf0]  ;;  %v1471_v54 = vor.u32 %v1916_v48, %v1468_v49  ;;  %v1450_v55 = vld [vmem:[#allocation2 + $0x40] sm:$0xf]  ;;  %v1595_v57 = vor.u32 %v1950_v50, %v1594_v47 }
  0x24   :  { %486 = vmatpush.bf16.msra.mxu2 %v1503_v30  ;;  %v1914_v56 = vld [vmem:[#allocation2 + $0x4c] sm:$0xf0]  ;;  %v1599_v58 = vor.u32 %v1948_v51, %v1596_v52  ;;  %v1578_v59 = vld [vmem:[#allocation2 + $0x140] sm:$0xf]  ;;  %v1912_v60 = vld [vmem:[#allocation2 + $0x44] sm:$0xf] }
  0x25   :  { %473 = vmatpush.bf16.msra.mxu1 %v1627_v33  ;;  %499 = vmatpush.bf16.msra.mxu3 %v1631_v34  ;;  %v1452_v61 = vld [vmem:[#allocation2 + $0x50] sm:$0xf0]  ;;  %v1946_v62 = vld [vmem:[#allocation2 + $0x14c] sm:$0xf0]  ;;  %v1944_v63 = vld [vmem:[#allocation2 + $0x144] sm:$0xf]  ;;  %v1451_v1 = vor.u32 %v1914_v56, %v1450_v55 }
  0x26   :  { %v1580_v0 = vld [vmem:[#allocation2 + $0x150] sm:$0xf0]  ;;  %v1434_v2 = vld [vmem:[#allocation2 + $0x20] sm:$0xf]  ;;  %v148_v3 = vld [vmem:[#allocation2 + $0x1c8] sm:$0x11]  ;;  %v1455_v4 = vor.u32 %v1912_v60, %v1452_v61  ;;  %v1579_v8 = vor.u32 %v1946_v62, %v1578_v59 }
  0x27   :  { %461 = vmatpush.bf16.msra.mxu0 %v1483_v41  ;;  %v1910_v5 = vld [vmem:[#allocation2 + $0x2c] sm:$0xf0]  ;;  %v1562_v6 = vld [vmem:[#allocation2 + $0x120] sm:$0xf]  ;;  %v82_v7 = vld [vmem:[%s2406_s0] sm:$0xf]  ;;  %v1583_v9 = vor.u32 %v1944_v63, %v1580_v0  ;;  %v321_v16 = vunpack.c.l.b16 %v148_v3  ;;  %v322_v40 = vunpack.c.h.b16 %v148_v3 }
  0x28   :  { %487 = vmatpush.bf16.msra.mxu2 %v1487_v42  ;;  %v1908_v10 = vld [vmem:[#allocation2 + $0x24] sm:$0xf]  ;;  %v1436_v11 = vld [vmem:[#allocation2 + $0x30] sm:$0xf0]  ;;  %84 = vst [vmem:[#allocation1] ss:$4 sm:$0xff] %v82_v7  ;;  %v1435_v17 = vor.u32 %v1910_v5, %v1434_v2 }
  0x29   :  { %474 = vmatpush.bf16.msra.mxu1 %v1611_v45  ;;  %500 = vmatpush.bf16.msra.mxu3 %v1615_v46  ;;  %v1942_v12 = vld [vmem:[#allocation2 + $0x12c] sm:$0xf0]  ;;  %v1940_v13 = vld [vmem:[#allocation2 + $0x124] sm:$0xf]  ;;  %v1564_v14 = vld [vmem:[#allocation2 + $0x130] sm:$0xf0]  ;;  %v1439_v18 = vor.u32 %v1908_v10, %v1436_v11  ;;  %v381_v29 = vpack.c.b16 %v321_v16, %v321_v16  ;;  %v382_v47 = vpack.c.b16 %v322_v40, %v322_v40 }
  0x2a   :  { %v1418_v19 = vld [vmem:[#allocation2] sm:$0xf]  ;;  %v1906_v20 = vld [vmem:[#allocation2 + $0xc] sm:$0xf0]  ;;  %v1563_v21 = vor.u32 %v1942_v12, %v1562_v6  ;;  %v1567_v22 = vor.u32 %v1940_v13, %v1564_v14  ;;  %v1904_v24 = vld [vmem:[#allocation2 + $0x4] sm:$0xf] }
  0x2b   :  { %462 = vmatpush.bf16.msra.mxu0 %v1467_v53  ;;  %v1546_v23 = vld [vmem:[#allocation2 + $0x100] sm:$0xf]  ;;  %v1420_v25 = vld [vmem:[#allocation2 + $0x10] sm:$0xf0]  ;;  %v1938_v26 = vld [vmem:[#allocation2 + $0x10c] sm:$0xf0]  ;;  %v1419_v30 = vor.u32 %v1906_v20, %v1418_v19  ;;  %v453_v38 = vand.u32 %v2222_v15, %v381_v29  ;;  %v456_v51 = vand.u32 %v2222_v15, %v382_v47 }
  0x2c   :  { %488 = vmatpush.bf16.msra.mxu2 %v1471_v54  ;;  %v1936_v27 = vld [vmem:[#allocation2 + $0x104] sm:$0xf]  ;;  %v1548_v28 = vld [vmem:[#allocation2 + $0x110] sm:$0xf0]  ;;  %v1538_v31 = vld [vmem:[#allocation2 + $0xe8] sm:$0xf]  ;;  %v1423_v32 = vor.u32 %v1904_v24, %v1420_v25  ;;  %v1547_v35 = vor.u32 %v1938_v26, %v1546_v23 }
  0x2d   :  { %475 = vmatpush.bf16.msra.mxu1 %v1595_v57  ;;  %501 = vmatpush.bf16.msra.mxu3 %v1599_v58  ;;  %v1935_v34 = vld [vmem:[#allocation2 + $0xf4] sm:$0xf0]  ;;  %v1551_v36 = vor.u32 %v1936_v27, %v1548_v28  ;;  %v1634_v42 = vld [vmem:[#allocation2 + $0x1a8] sm:$0xf]  ;;  %v1933_v52 = vld [vmem:[#allocation2 + $0xec] sm:$0xf] }
  0x2e   :  { %v1539_v41 = vor.u32 %v1935_v34, %v1538_v31  ;;  %v1959_v43 = vld [vmem:[#allocation2 + $0x1b4] sm:$0xf0]  ;;  %v1522_v45 = vld [vmem:[#allocation2 + $0xc8] sm:$0xf]  ;;  %v1540_v53 = vld [vmem:[#allocation2 + $0xf8] sm:$0xf0] }
  0x2f   :  { %463 = vmatpush.bf16.msra.mxu0 %v1451_v1  ;;  %v85_v33 = vld.sshfl [vmem:[#allocation1] sm:$0xff pattern:$0x73625140]  ;;  %v86_v37 = vld.sshfl [vmem:[#allocation1 + $0x8] sm:$0xff pattern:$0x73625140]  ;;  %v1635_v50 = vor.u32 %v1959_v43, %v1634_v42  ;;  %v1543_v56 = vor.u32 %v1933_v52, %v1540_v53 }
  0x30   :  { %489 = vmatpush.bf16.msra.mxu2 %v1455_v4  ;;  %v2230_v39 = vpack.c.bf16 %v85_v33, %v85_v33  ;;  %v2232_v44 = vpack.c.bf16 %v86_v37, %v86_v37  ;;  %v1931_v46 = vld [vmem:[#allocation2 + $0xd4] sm:$0xf0]  ;;  %v1618_v48 = vld [vmem:[#allocation2 + $0x188] sm:$0xf]  ;;  %v1957_v54 = vld [vmem:[#allocation2 + $0x1ac] sm:$0xf] }
  0x31   :  { %476 = vmatpush.bf16.msra.mxu1 %v1579_v8  ;;  %502 = vmatpush.bf16.msra.mxu3 %v1583_v9  ;;  %v1955_v49 = vld [vmem:[#allocation2 + $0x194] sm:$0xf0]  ;;  %v1523_v55 = vor.u32 %v1931_v46, %v1522_v45  ;;  %v1636_v57 = vld [vmem:[#allocation2 + $0x1b8] sm:$0xf0]  ;;  %v1929_v58 = vld [vmem:[#allocation2 + $0xcc] sm:$0xf] }
  0x32   :  { %v1524_v59 = vld [vmem:[#allocation2 + $0xd8] sm:$0xf0]  ;;  %v1506_v60 = vld [vmem:[#allocation2 + $0xa8] sm:$0xf]  ;;  %v1927_v61 = vld [vmem:[#allocation2 + $0xb4] sm:$0xf0]  ;;  %v1639_v15 = vor.u32 %v1957_v54, %v1636_v57  ;;  %v1619_v0 = vor.u32 %v1955_v49, %v1618_v48 }
  0x33   :  { %464 = vmatpush.bf16.msra.mxu0 %v1435_v17  ;;  %v1527_v62 = vor.u32 %v1929_v58, %v1524_v59  ;;  %v1953_v63 = vld [vmem:[#allocation2 + $0x18c] sm:$0xf]  ;;  %v1620_v1 = vld [vmem:[#allocation2 + $0x198] sm:$0xf0]  ;;  %v1507_v4 = vor.u32 %v1927_v61, %v1506_v60  ;;  %v1602_v5 = vld [vmem:[#allocation2 + $0x168] sm:$0xf] }
  0x34   :  { %490 = vmatpush.bf16.msra.mxu2 %v1439_v18  ;;  %v1925_v2 = vld [vmem:[#allocation2 + $0xac] sm:$0xf]  ;;  %v1508_v3 = vld [vmem:[#allocation2 + $0xb8] sm:$0xf0]  ;;  %v1951_v6 = vld [vmem:[#allocation2 + $0x174] sm:$0xf0]  ;;  %v1623_v9 = vor.u32 %v1953_v63, %v1620_v1 }
  0x35   :  { %477 = vmatpush.bf16.msra.mxu1 %v1563_v21  ;;  %503 = vmatpush.bf16.msra.mxu3 %v1567_v22  ;;  %v1490_v7 = vld [vmem:[#allocation2 + $0x88] sm:$0xf]  ;;  %v1923_v8 = vld [vmem:[#allocation2 + $0x94] sm:$0xf0]  ;;  %v1511_v10 = vor.u32 %v1925_v2, %v1508_v3  ;;  %v1949_v11 = vld [vmem:[#allocation2 + $0x16c] sm:$0xf]  ;;  %v1603_v12 = vor.u32 %v1951_v6, %v1602_v5 }
  0x36   :  { %v1604_v13 = vld [vmem:[#allocation2 + $0x178] sm:$0xf0]  ;;  %v1921_v14 = vld [vmem:[#allocation2 + $0x8c] sm:$0xf]  ;;  %v1491_v17 = vor.u32 %v1923_v8, %v1490_v7  ;;  %v1586_v18 = vld [vmem:[#allocation2 + $0x148] sm:$0xf] }
  0x37   :  { %465 = vmatpush.bf16.msra.mxu0 %v1419_v30  ;;  %v1492_v16 = vld [vmem:[#allocation2 + $0x98] sm:$0xf0]  ;;  %v1947_v19 = vld [vmem:[#allocation2 + $0x154] sm:$0xf0]  ;;  %v1474_v20 = vld [vmem:[#allocation2 + $0x68] sm:$0xf]  ;;  %v1607_v22 = vor.u32 %v1949_v11, %v1604_v13 }
  0x38   :  { %491 = vmatpush.bf16.msra.mxu2 %v1423_v32  ;;  %v1919_v21 = vld [vmem:[#allocation2 + $0x74] sm:$0xf0]  ;;  %v1495_v23 = vor.u32 %v1921_v14, %v1492_v16  ;;  %v1945_v24 = vld [vmem:[#allocation2 + $0x14c] sm:$0xf]  ;;  %v1587_v25 = vor.u32 %v1947_v19, %v1586_v18  ;;  %v1588_v26 = vld [vmem:[#allocation2 + $0x158] sm:$0xf0] }
  0x39   :  { %478 = vmatpush.bf16.msra.mxu1 %v1547_v35  ;;  %504 = vmatpush.bf16.msra.mxu3 %v1551_v36  ;;  %v1917_v27 = vld [vmem:[#allocation2 + $0x6c] sm:$0xf]  ;;  %v1476_v28 = vld [vmem:[#allocation2 + $0x78] sm:$0xf0]  ;;  %v1475_v29 = vor.u32 %v1919_v21, %v1474_v20  ;;  %v1570_v30 = vld [vmem:[#allocation2 + $0x128] sm:$0xf]  ;;  %v1591_v34 = vor.u32 %v1945_v24, %v1588_v26 }
  0x3a   :  { %466 = vmatmul.bf16.vlgmr.msra.gmra.mxu0 %v2230_v39  ;;  %v1943_v31 = vld [vmem:[#allocation2 + $0x134] sm:$0xf0]  ;;  %v1458_v32 = vld [vmem:[#allocation2 + $0x48] sm:$0xf]  ;;  %v1479_v35 = vor.u32 %v1917_v27, %v1476_v28  ;;  %v1941_v36 = vld [vmem:[#allocation2 + $0x12c] sm:$0xf] }
  0x3b   :  { %492 = vmatmul.bf16.vlgmr.msra.gmra.mxu2 %v2230_v39  ;;  %536 = vmatpush.bf16.msrb.mxu0 %v1543_v56  ;;  %v1915_v33 = vld [vmem:[#allocation2 + $0x54] sm:$0xf0]  ;;  %v1571_v37 = vor.u32 %v1943_v31, %v1570_v30  ;;  %v1913_v40 = vld [vmem:[#allocation2 + $0x4c] sm:$0xf]  ;;  %v1554_v43 = vld [vmem:[#allocation2 + $0x108] sm:$0xf] }
  0x3c   :  { %1640 = vmatmul.msk.bf16.vlgmr.msra.gmra.mxu1 %vm439_vm1, %v2232_v44  ;;  %1641 = vmatmul.msk.bf16.vlgmr.msra.gmra.mxu3 %vm439_vm1, %v2232_v44  ;;  %v1459_v42 = vor.u32 %v1915_v33, %v1458_v32  ;;  %v1939_v45 = vld [vmem:[#allocation2 + $0x114] sm:$0xf0]  ;;  %v1442_v46 = vld [vmem:[#allocation2 + $0x28] sm:$0xf]  ;;  %v1556_v52 = vld [vmem:[#allocation2 + $0x118] sm:$0xf0] }
  0x3d   :  { %524 = vmatpush.bf16.msrb.mxu3 %v453_v38  ;;  %510 = vmatpush.bf16.msrb.mxu1 %v1539_v41  ;;  %v1572_v38 = vld [vmem:[#allocation2 + $0x138] sm:$0xf0]  ;;  %v1911_v47 = vld [vmem:[#allocation2 + $0x34] sm:$0xf0]  ;;  %v1909_v54 = vld [vmem:[#allocation2 + $0x2c] sm:$0xf] }
  0x3e   :  { %550 = vmatpush.bf16.msrb.mxu2 %v456_v51  ;;  %v1460_v41 = vld [vmem:[#allocation2 + $0x58] sm:$0xf0]  ;;  %v1575_v48 = vor.u32 %v1941_v36, %v1572_v38  ;;  %v1937_v51 = vld [vmem:[#allocation2 + $0x10c] sm:$0xf]  ;;  %v1443_v53 = vor.u32 %v1911_v47, %v1442_v46  ;;  %v1426_v56 = vld [vmem:[#allocation2 + $0x8] sm:$0xf] }
  0x3f   :  { %537 = vmatpush.bf16.msrb.mxu0 %v1527_v62  ;;  %v1463_v49 = vor.u32 %v1913_v40, %v1460_v41  ;;  %v1907_v57 = vld [vmem:[#allocation2 + $0x14] sm:$0xf0]  ;;  %v1559_v58 = vor.u32 %v1937_v51, %v1556_v52  ;;  %v1905_v61 = vld [vmem:[#allocation2 + $0xc] sm:$0xf]  ;;  %vm562_vm2 = vcmask 1041408   ;;  %s684_s23 = sld [smem:[#allocation8]] }
  0x40   :  { %v1427_v60 = vor.u32 %v1907_v57, %v1426_v56  ;;  %s704_s24 = sld [smem:[#allocation9]] }
  0x41   :  { %525 = vmatpush.bf16.msrb.mxu3 %v1635_v50  ;;  %511 = vmatpush.bf16.msrb.mxu1 %v1523_v55  ;;  %v1555_v50 = vor.u32 %v1939_v45, %v1554_v43  ;;  %v1444_v55 = vld [vmem:[#allocation2 + $0x38] sm:$0xf0]  ;;  %s1644_s1 = sld [smem:[#allocation8 + $0x1]] }
  0x42   :  { %551 = vmatpush.bf16.msrb.mxu2 %v1639_v15  ;;  %v1447_v59 = vor.u32 %v1909_v54, %v1444_v55  ;;  %v1428_v15 = vld [vmem:[#allocation2 + $0x18] sm:$0xf0]  ;;  %s2348_s12 = sld [smem:[#allocation9 + $0x1]] }
  0x43   :  { %538 = vmatpush.bf16.msrb.mxu0 %v1511_v10  ;;  %v1431_v62 = vor.u32 %v1905_v61, %v1428_v15  ;;  %v623_v10 = vlaneseq }
  0x45   :  { %526 = vmatpush.bf16.msrb.mxu3 %v1619_v0  ;;  %512 = vmatpush.bf16.msrb.mxu1 %v1507_v4  ;;  %v2261_v20 = vand.u32 127, %v623_v10 }
  0x46   :  { %552 = vmatpush.bf16.msrb.mxu2 %v1623_v9 }
  0x47   :  { %539 = vmatpush.bf16.msrb.mxu0 %v1495_v23  ;;  %v2264_v28 = vadd.s32 128, %v2261_v20 }
  0x49   :  { %527 = vmatpush.bf16.msrb.mxu3 %v1603_v12  ;;  %513 = vmatpush.bf16.msrb.mxu1 %v1491_v17  ;;  %vm633_vm3 = vcmp.lt.s32.totalorder %v2264_v28, 169  ;;  %vm713_vm4 = vcmp.ge.s32.totalorder %v2264_v28, 169 }
  0x4a   :  { %553 = vmatpush.bf16.msrb.mxu2 %v1607_v22 }
  0x4b   :  { %540 = vmatpush.bf16.msrb.mxu0 %v1479_v35 }
  0x4d   :  { %528 = vmatpush.bf16.msrb.mxu3 %v1587_v25  ;;  %514 = vmatpush.bf16.msrb.mxu1 %v1475_v29 }
  0x4e   :  { %554 = vmatpush.bf16.msrb.mxu2 %v1591_v34 }
  0x4f   :  { %541 = vmatpush.bf16.msrb.mxu0 %v1463_v49 }
  0x51   :  { %529 = vmatpush.bf16.msrb.mxu3 %v1571_v37  ;;  %515 = vmatpush.bf16.msrb.mxu1 %v1459_v42 }
  0x52   :  { %555 = vmatpush.bf16.msrb.mxu2 %v1575_v48 }
  0x53   :  { %542 = vmatpush.bf16.msrb.mxu0 %v1447_v59 }
  0x55   :  { %530 = vmatpush.bf16.msrb.mxu3 %v1555_v50  ;;  %516 = vmatpush.bf16.msrb.mxu1 %v1443_v53 }
  0x56   :  { %556 = vmatpush.bf16.msrb.mxu2 %v1559_v58 }
  0x57   :  { %543 = vmatpush.bf16.msrb.mxu0 %v1431_v62 }
  0x58   :  { %1642 = vmatmul.msk.bf16.vlgmr.msrb.gmra.mxu3 %vm439_vm1, %v2232_v44 }
  0x59   :  { %517 = vmatpush.bf16.msrb.mxu1 %v1427_v60  ;;  %1643 = vmatmul.msk.bf16.vlgmr.msrb.gmra.mxu2 %vm439_vm1, %v2232_v44 }
  0x5a   :  { %544 = vmatmul.bf16.vlgmr.msrb.gmra.mxu0 %v2230_v39 }
  0x5c   :  { %518 = vmatmul.bf16.vlgmr.msrb.gmra.mxu1 %v2230_v39 }
  0xb7   :  { %v467_v63 = vpop.f32.mrf.mxu0 }
  0xb9   :  { %v480_v0 = vpop.f32.mrf.mxu1 }
  0xba   :  { %v2247_v1 = vadd.f32 %v480_v0, %v467_v63 }
  0xbc   :  { %v563_v2 = vsel %vm562_vm2, %v2247_v1, 0.0  ;;  %v591_v3 = vmul.f32 %v2247_v1, %v2247_v1 }
  0xbd   :  { %v564_v4 = vrot.slane %v563_v2, 4 }
  0xbe   :  { %v595_v5 = vsel %vm562_vm2, %v591_v3, 0.0  ;;  %v493_v44 = vpop.f32.mrf.mxu2 }
  0xbf   :  { %v565_v6 = vadd.f32 %v564_v4, %v563_v2  ;;  %v506_v7 = vpop.f32.mrf.mxu3  ;;  %v469_v8 = vpop.f32.mrf.mxu0  ;;  %v596_v9 = vrot.slane %v595_v5, 4 }
  0xc0   :  { %v2254_v39 = vadd.f32 %v506_v7, %v493_v44 }
  0xc1   :  { %v482_v11 = vpop.f32.mrf.mxu1  ;;  %v566_v12 = vrot.slane %v565_v6, 2  ;;  %v597_v17 = vadd.f32 %v596_v9, %v595_v5 }
  0xc2   :  { %v570_v13 = vsel %vm562_vm2, %v2254_v39, 0.0  ;;  %v592_v14 = vmul.f32 %v2254_v39, %v2254_v39 }
  0xc3   :  { %v571_v16 = vrot.slane %v570_v13, 4  ;;  %v567_v19 = vadd.f32 %v566_v12, %v565_v6  ;;  %v598_v29 = vrot.slane %v597_v17, 2  ;;  %v2293_v6 = vadd.s32 256, %v2261_v20 }
  0xc4   :  { %v602_v18 = vsel %vm562_vm2, %v592_v14, 0.0 }
  0xc5   :  { %v572_v21 = vadd.f32 %v571_v16, %v570_v13  ;;  %v603_v22 = vrot.slane %v602_v18, 4  ;;  %v568_v27 = vrot.slane %v567_v19, 1  ;;  %v599_v35 = vadd.f32 %v598_v29, %v597_v17 }
  0xc6   :  { %v495_v23 = vpop.f32.mrf.mxu2  ;;  %vm718_vm5 = vcmp.lt.s32.totalorder %v2293_v6, 338  ;;  %vm798_vm6 = vcmp.ge.s32.totalorder %v2293_v6, 338 }
  0xc7   :  { %v604_v24 = vadd.f32 %v603_v22, %v602_v18  ;;  %v508_v25 = vpop.f32.mrf.mxu3  ;;  %v573_v26 = vrot.slane %v572_v21, 2  ;;  %v569_v34 = vadd.f32 %v568_v27, %v567_v19  ;;  %v600_v43 = vrot.slane %v599_v35, 1 }
  0xc8   :  { %v2297_v18 = vadd.s32 384, %v2261_v20 }
  0xc9   :  { %v574_v30 = vadd.f32 %v573_v26, %v572_v21  ;;  %v605_v31 = vrot.slane %v604_v24, 2  ;;  %v644_v41 = vsel %vm443_vm0, %v569_v34, 0.0  ;;  %v601_v47 = vadd.f32 %v600_v43, %v599_v35 }
  0xca   :  { %vm803_vm7 = vcmp.lt.s32.totalorder %v2297_v18, 507 }
  0xcb   :  { %v575_v32 = vrot.slane %v574_v30, 1  ;;  %v606_v33 = vadd.f32 %v605_v31, %v604_v24  ;;  %v664_v51 = vsel %vm443_vm0, %v601_v47, 0.0 }
  0xcd   :  { %v576_v36 = vadd.f32 %v575_v32, %v574_v30  ;;  %v607_v37 = vrot.slane %v606_v33, 1 }
  0xcf   :  { %v641_v38 = vsel %vm633_vm3, %v576_v36, 0.0  ;;  %v2269_v40 = vadd.f32 %v607_v37, %v606_v33  ;;  %v725_v23 = vsel %vm713_vm4, %v576_v36, 0.0 }
  0xd0   :  { %v645_v42 = vsel %vm443_vm0, %v641_v38, 0.0  ;;  %v729_v30 = vsel %vm443_vm0, %v725_v23, 0.0 }
  0xd1   :  { %v646_v45 = vadd.f32 %v645_v42, %v644_v41  ;;  %v661_v46 = vsel %vm633_vm3, %v2269_v40, 0.0 }
  0xd2   :  { %v665_v48 = vsel %vm443_vm0, %v661_v46, 0.0  ;;  %v745_v46 = vsel %vm713_vm4, %v2269_v40, 0.0 }
  0xd3   :  { %651 = vadd.xlane.f32.xlu0 %v646_v45  ;;  %v666_v53 = vadd.f32 %v665_v48, %v664_v51 }
  0xd7   :  { %v545_v54 = vpop.f32.mrf.mxu0 }
  0xd9   :  { %v519_v49 = vpop.f32.mrf.mxu1 }
  0xdb   :  { %v532_v50 = vpop.f32.mrf.mxu3  ;;  %671 = vadd.xlane.f32.xlu0 %v666_v53 }
  0xdc   :  { %v2278_v52 = vadd.f32 %v532_v50, %v519_v49  ;;  %v558_v57 = vpop.f32.mrf.mxu2  ;;  %v749_v50 = vsel %vm443_vm0, %v745_v46, 0.0  ;;  %v1650_v46 = vld [vmem:[#allocation6] sm:$0xf] }
  0xdd   :  { %v2284_v59 = vadd.f32 %v558_v57, %v545_v54 }
  0xde   :  { %v577_v55 = vsel %vm562_vm2, %v2278_v52, 0.0  ;;  %v593_v56 = vmul.f32 %v2278_v52, %v2278_v52 }
  0xdf   :  { %v578_v58 = vrot.slane %v577_v55, 4  ;;  %v584_v62 = vsel %vm562_vm2, %v2284_v59, 0.0  ;;  %v594_v63 = vmul.f32 %v2284_v59, %v2284_v59  ;;  %v547_v11 = vpop.f32.mrf.mxu0 }
  0xe0   :  { %v609_v60 = vsel %vm562_vm2, %v593_v56, 0.0  ;;  %v585_v0 = vrot.slane %v584_v62, 4  ;;  %v1690_v11 = vld [vmem:[#allocation6 + $0x50] sm:$0xf] }
  0xe1   :  { %v579_v61 = vadd.f32 %v578_v58, %v577_v55  ;;  %v610_v15 = vrot.slane %v609_v60, 4  ;;  %v521_v2 = vpop.f32.mrf.mxu1  ;;  %v616_v5 = vsel %vm562_vm2, %v594_v63, 0.0 }
  0xe2   :  { %v586_v7 = vadd.f32 %v585_v0, %v584_v62  ;;  %v617_v8 = vrot.slane %v616_v5, 4 }
  0xe3   :  { %v611_v3 = vadd.f32 %v610_v15, %v609_v60  ;;  %v580_v4 = vrot.slane %v579_v61, 2  ;;  %v534_v44 = vpop.f32.mrf.mxu3 }
  0xe4   :  { %v618_v12 = vadd.f32 %v617_v8, %v616_v5  ;;  %v587_v13 = vrot.slane %v586_v7, 2  ;;  %v560_v14 = vpop.f32.mrf.mxu2  ;;  %v1706_v5 = vld [vmem:[#allocation6 + $0x70] sm:$0xf]  ;;  %v1975_v44 = vld [vmem:[#allocation6 + $0x74] sm:$0xf0] }
  0xe5   :  { %v581_v9 = vadd.f32 %v580_v4, %v579_v61  ;;  %v612_v10 = vrot.slane %v611_v3, 2  ;;  %v1707_v8 = vor.u32 %v1975_v44, %v1706_v5  ;;  %v1966_v5 = vld [vmem:[#allocation6 + $0x34] sm:$0xf]  ;;  %v1676_v44 = vld [vmem:[#allocation6 + $0x38] sm:$0xf0] }
  0xe6   :  { %v588_v19 = vadd.f32 %v587_v13, %v586_v7  ;;  %v619_v21 = vrot.slane %v618_v12, 2  ;;  %v1698_v7 = vld [vmem:[#allocation6 + $0x60] sm:$0xf] }
  0xe7   :  { %v582_v16 = vrot.slane %v581_v9, 1  ;;  %v613_v17 = vadd.f32 %v612_v10, %v611_v3  ;;  %1286 = vmatpush.bf16.msra.mxu3 %v1707_v8  ;;  %v1964_v8 = vld [vmem:[#allocation6 + $0x24] sm:$0xf] }
  0xe8   :  { %v589_v25 = vrot.slane %v588_v19, 1  ;;  %v620_v26 = vadd.f32 %v619_v21, %v618_v12  ;;  %v1971_v12 = vld [vmem:[#allocation6 + $0x54] sm:$0xf0] }
  0xe9   :  { %v583_v22 = vadd.f32 %v582_v16, %v581_v9  ;;  %v614_v24 = vrot.slane %v613_v17, 1  ;;  %v1973_v9 = vld [vmem:[#allocation6 + $0x64] sm:$0xf0]  ;;  %v1691_v14 = vor.u32 %v1971_v12, %v1690_v11  ;;  %v1682_v16 = vld [vmem:[#allocation6 + $0x40] sm:$0xf] }
  0xea   :  { %v590_v32 = vadd.f32 %v589_v25, %v588_v19  ;;  %v621_v33 = vrot.slane %v620_v26, 1  ;;  %v1699_v10 = vor.u32 %v1973_v9, %v1698_v7  ;;  %v1967_v25 = vld [vmem:[#allocation6 + $0x34] sm:$0xf0]  ;;  %v1679_v7 = vor.u32 %v1966_v5, %v1676_v44  ;;  %v1668_v9 = vld [vmem:[#allocation6 + $0x28] sm:$0xf0] }
  0xeb   :  { %v726_v27 = vsel %vm718_vm5, %v583_v22, 0.0  ;;  %v615_v29 = vadd.f32 %v614_v24, %v613_v17  ;;  %v810_v20 = vsel %vm798_vm6, %v583_v22, 0.0  ;;  %v1969_v17 = vld [vmem:[#allocation6 + $0x44] sm:$0xf0]  ;;  %v1674_v24 = vld [vmem:[#allocation6 + $0x30] sm:$0xf] }
  0xec   :  { %v731_v31 = vsel %vm443_vm0, %v726_v27, 0.0  ;;  %v815_v35 = vsel %vm443_vm0, %v810_v20, 0.0  ;;  %v811_v36 = vsel %vm803_vm7, %v590_v32, 0.0  ;;  %v622_v37 = vadd.f32 %v621_v33, %v620_v26  ;;  %1287 = vmatpush.bf16.msra.mxu3 %v1699_v10  ;;  %v1666_v20 = vld [vmem:[#allocation6 + $0x20] sm:$0xf] }
  0xed   :  { %v732_v34 = vadd.f32 %v731_v31, %v729_v30  ;;  %v746_v38 = vsel %vm718_vm5, %v615_v29, 0.0  ;;  %v817_v41 = vsel %vm443_vm0, %v811_v36, 0.0  ;;  %v830_v43 = vsel %vm798_vm6, %v615_v29, 0.0  ;;  %v1965_v30 = vld [vmem:[#allocation6 + $0x24] sm:$0xf0] }
  0xee   :  { %v818_v42 = vadd.f32 %v817_v41, %v815_v35  ;;  %v831_v45 = vsel %vm803_vm7, %v622_v37, 0.0  ;;  %v751_v47 = vsel %vm443_vm0, %v746_v38, 0.0  ;;  %v835_v48 = vsel %vm443_vm0, %v830_v43, 0.0  ;;  %v1658_v36 = vld [vmem:[#allocation6 + $0x10] sm:$0xf] }
  0xef   :  { %735 = vadd.xlane.f32.xlu1 %v732_v34  ;;  %v837_v49 = vsel %vm443_vm0, %v831_v45, 0.0  ;;  %v752_v51 = vadd.f32 %v751_v47, %v749_v50  ;;  %v1683_v23 = vor.u32 %v1969_v17, %v1682_v16  ;;  %v1675_v29 = vor.u32 %v1967_v25, %v1674_v24  ;;  %v1963_v37 = vld [vmem:[#allocation6 + $0x14] sm:$0xf0]  ;;  %v1961_v47 = vld [vmem:[#allocation6 + $0x4] sm:$0xf0] }
  0xf0   :  { %819 = vadd.xlane.f32.xlu2 %v818_v42  ;;  %v838_v53 = vadd.f32 %v837_v49, %v835_v48  ;;  %1288 = vmatpush.bf16.msra.mxu3 %v1691_v14  ;;  %v1667_v35 = vor.u32 %v1965_v30, %v1666_v20  ;;  %v1659_v45 = vor.u32 %v1963_v37, %v1658_v36  ;;  %v1974_v50 = vld [vmem:[#allocation6 + $0x74] sm:$0xf]  ;;  %v1660_v12 = vld [vmem:[#allocation6 + $0x18] sm:$0xf0]  ;;  %v1960_v14 = vld [vmem:[#allocation6 + $0x4] sm:$0xf] }
  0xf1   :  { %v1671_v10 = vor.u32 %v1964_v8, %v1668_v9  ;;  %v1962_v11 = vld [vmem:[#allocation6 + $0x14] sm:$0xf]  ;;  %v1652_v16 = vld [vmem:[#allocation6 + $0x8] sm:$0xf0]  ;;  %v1989_v25 = vld [vmem:[#allocation6 + $0xe4] sm:$0xf0] }
  0xf2   :  { %v1655_v17 = vor.u32 %v1960_v14, %v1652_v16  ;;  %v1987_v20 = vld [vmem:[#allocation6 + $0xd4] sm:$0xf0]  ;;  %v1985_v36 = vld [vmem:[#allocation6 + $0xc4] sm:$0xf0]  ;;  %v1988_v14 = vld [vmem:[#allocation6 + $0xe4] sm:$0xf] }
  0xf3   :  { %v1764_v16 = vld [vmem:[#allocation6 + $0xe8] sm:$0xf0] }
  0xf4   :  { %1289 = vmatpush.bf16.msra.mxu3 %v1683_v23  ;;  %v1762_v23 = vld [vmem:[#allocation6 + $0xe0] sm:$0xf] }
  0xf7   :  { %755 = vadd.xlane.f32.xlu1 %v752_v51  ;;  %v1708_v51 = vld [vmem:[#allocation6 + $0x78] sm:$0xf0] }
  0xf8   :  { %839 = vadd.xlane.f32.xlu2 %v838_v53  ;;  %1290 = vmatpush.bf16.msra.mxu3 %v1675_v29  ;;  %v1754_v29 = vld [vmem:[#allocation6 + $0xd0] sm:$0xf] }
  0xfc   :  { %1291 = vmatpush.bf16.msra.mxu3 %v1667_v35  ;;  %v1746_v35 = vld [vmem:[#allocation6 + $0xc0] sm:$0xf] }
 0x100   :  { %1292 = vmatpush.bf16.msra.mxu3 %v1659_v45 }
 0x146   :  { %v652_v54 = vpop.xlane.xlu0 %651 }
 0x147   :  { %v653_v55 = vrot.slane %v652_v54, 4 }
 0x149   :  { %v654_v56 = vadd.f32 %v653_v55, %v652_v54  ;;  %v1651_v55 = vor.u32 %v1961_v47, %v1650_v46  ;;  %v1738_v46 = vld [vmem:[#allocation6 + $0xb0] sm:$0xf] }
 0x14b   :  { %v655_v57 = vrot.slane %v654_v56, 2  ;;  %1293 = vmatpush.bf16.msra.mxu3 %v1651_v55 }
 0x14d   :  { %v656_v58 = vadd.f32 %v655_v57, %v654_v56  ;;  %v1711_v56 = vor.u32 %v1974_v50, %v1708_v51  ;;  %v1730_v50 = vld [vmem:[#allocation6 + $0xa0] sm:$0xf]  ;;  %v1981_v51 = vld [vmem:[#allocation6 + $0xa4] sm:$0xf0] }
 0x14e   :  { %v672_v60 = vpop.xlane.xlu0 %671 }
 0x14f   :  { %v673_v40 = vrot.slane %v672_v60, 4  ;;  %v657_v61 = vrot.slane %v656_v58, 1  ;;  %1338 = vmatpush.bf16.msrb.mxu3 %v1711_v56 }
 0x151   :  { %v674_v15 = vadd.f32 %v673_v40, %v672_v60  ;;  %v658_v62 = vadd.f32 %v657_v61, %v656_v58  ;;  %v1972_v40 = vld [vmem:[#allocation6 + $0x64] sm:$0xf]  ;;  %v1700_v61 = vld [vmem:[#allocation6 + $0x68] sm:$0xf0] }
 0x153   :  { %v675_v63 = vrot.slane %v674_v15, 2  ;;  %2024 = vpush %v658_v62  ;;  %v1970_v62 = vld [vmem:[#allocation6 + $0x54] sm:$0xf] }
 0x155   :  { %v676_v0 = vadd.f32 %v675_v63, %v674_v15  ;;  %v1703_v15 = vor.u32 %v1972_v40, %v1700_v61  ;;  %v1692_v63 = vld [vmem:[#allocation6 + $0x58] sm:$0xf0] }
 0x157   :  { %v677_v2 = vrot.slane %v676_v0, 1  ;;  %1339 = vmatpush.bf16.msrb.mxu3 %v1703_v15 }
 0x159   :  { %v678_v3 = vadd.f32 %v677_v2, %v676_v0  ;;  %v1695_v0 = vor.u32 %v1970_v62, %v1692_v63  ;;  %v1968_v2 = vld [vmem:[#allocation6 + $0x44] sm:$0xf] }
 0x15b   :  { %2026 = vpush %v678_v3  ;;  %1340 = vmatpush.bf16.msrb.mxu3 %v1695_v0  ;;  %v1684_v3 = vld [vmem:[#allocation6 + $0x48] sm:$0xf0]  ;;  %v1714_v0 = vld [vmem:[#allocation6 + $0x80] sm:$0xf] }
 0x162   :  { %v736_v4 = vpop.xlane.xlu1 %735 }
 0x163   :  { %v737_v19 = vrot.slane %v736_v4, 4 }
 0x165   :  { %v738_v26 = vadd.f32 %v737_v19, %v736_v4  ;;  %v1687_v4 = vor.u32 %v1968_v2, %v1684_v3  ;;  %v820_v19 = vpop.xlane.xlu2 %819  ;;  %v1977_v2 = vld [vmem:[#allocation6 + $0x84] sm:$0xf0] }
 0x166   :  { %v821_v37 = vrot.slane %v820_v19, 4 }
 0x167   :  { %v739_v31 = vrot.slane %v738_v26, 2  ;;  %1341 = vmatpush.bf16.msrb.mxu3 %v1687_v4 }
 0x168   :  { %v822_v47 = vadd.f32 %v821_v37, %v820_v19  ;;  %v1986_v19 = vld [vmem:[#allocation6 + $0xd4] sm:$0xf]  ;;  %v1976_v37 = vld [vmem:[#allocation6 + $0x84] sm:$0xf] }
 0x169   :  { %v740_v41 = vadd.f32 %v739_v31, %v738_v26 }
 0x16a   :  { %v756_v13 = vpop.xlane.xlu1 %755 }
 0x16b   :  { %v757_v21 = vrot.slane %v756_v13, 4  ;;  %v741_v49 = vrot.slane %v740_v41, 1  ;;  %1342 = vmatpush.bf16.msrb.mxu3 %v1679_v7  ;;  %v1715_v7 = vor.u32 %v1977_v2, %v1714_v0  ;;  %v1810_v2 = vld [vmem:[#allocation6 + $0x140] sm:$0xf] }
 0x16d   :  { %v758_v27 = vadd.f32 %v757_v21, %v756_v13  ;;  %v742_v58 = vadd.f32 %v741_v49, %v740_v41  ;;  %v1663_v13 = vor.u32 %v1962_v11, %v1660_v12  ;;  %v1770_v21 = vld [vmem:[#allocation6 + $0xf0] sm:$0xf]  ;;  %v840_v31 = vpop.xlane.xlu2 %839  ;;  %v1990_v11 = vld [vmem:[#allocation6 + $0xf4] sm:$0xf]  ;;  %v1772_v12 = vld [vmem:[#allocation6 + $0xf8] sm:$0xf0] }
 0x16f   :  { %v759_v33 = vrot.slane %v758_v27, 2  ;;  %1343 = vmatpush.bf16.msrb.mxu3 %v1671_v10 }
 0x171   :  { %v760_v42 = vadd.f32 %v759_v33, %v758_v27  ;;  %v1763_v27 = vor.u32 %v1989_v25, %v1762_v23  ;;  %v1755_v33 = vor.u32 %v1987_v20, %v1754_v29  ;;  %v1984_v23 = vld [vmem:[#allocation6 + $0xc4] sm:$0xf]  ;;  %v1740_v29 = vld [vmem:[#allocation6 + $0xb8] sm:$0xf0] }
 0x173   :  { %v761_v53 = vrot.slane %v760_v42, 1  ;;  %1344 = vmatpush.bf16.msrb.mxu3 %v1663_v13  ;;  %v1775_v13 = vor.u32 %v1990_v11, %v1772_v12  ;;  %v1999_v11 = vld [vmem:[#allocation6 + $0x134] sm:$0xf0]  ;;  %v1866_v12 = vld [vmem:[#allocation6 + $0x1b0] sm:$0xf] }
 0x175   :  { %v762_v60 = vadd.f32 %v761_v53, %v760_v42  ;;  %v823_v53 = vrot.slane %v822_v47, 2 }
 0x177   :  { %1345 = vmatpush.bf16.msrb.mxu3 %v1655_v17  ;;  %v824_v61 = vadd.f32 %v823_v53, %v822_v47  ;;  %v1767_v17 = vor.u32 %v1988_v14, %v1764_v16  ;;  %v1826_v47 = vld [vmem:[#allocation6 + $0x160] sm:$0xf] }
 0x179   :  { %v825_v4 = vrot.slane %v824_v61, 1 }
 0x17b   :  { %v826_v9 = vadd.f32 %v825_v4, %v824_v61  ;;  %v2019_v61 = vld [vmem:[#allocation6 + $0x1d4] sm:$0xf0] }
 0x184   :  { %s2025_s0 = spop %2024 }
 0x185   :  { %s2327_s17 = smul.f32 0.00295858, %s2025_s0 }
 0x187   :  { %s682_s18 = smul.f32 %s2327_s17, %s2327_s17 }
 0x18c   :  { %s2027_s19 = spop %2026 }
 0x18d   :  { %s681_s20 = smul.f32 0.00295858, %s2027_s19 }
 0x18f   :  { %s683_s21 = ssub.f32 %s681_s20, %s682_s18 }
 0x190   :  { %s1646_s20 = sld [smem:[#allocation8 + $0x2]] }
 0x191   :  { %s685_s22 = sadd.f32 1e-05, %s683_s21 }
 0x192   :  { %s1647_s21 = sld [smem:[#allocation9 + $0x2]] }
 0x193   :  { %v686_v22 = vstv %s685_s22 }
 0x194   :  { %2052 = vrsqrt.f32 %v686_v22  ;;  %vm693_vm9 = vweird.f32 %v686_v22 }
 0x19a   :  { %v2053_v32 = vpop.eup %2052 }
 0x19b   :  { %v688_v34 = vmul.f32 %v2053_v32, %v686_v22  ;;  %vm694_vm8 = vweird.f32 %v2053_v32  ;;  %v1991_v22 = vld [vmem:[#allocation6 + $0xf4] sm:$0xf0] }
 0x19c   :  { %vm695_vm10 = vmor %vm693_vm9, %vm694_vm8  ;;  %v1771_v24 = vor.u32 %v1991_v22, %v1770_v21  ;;  %v1756_v21 = vld [vmem:[#allocation6 + $0xd8] sm:$0xf0] }
 0x19d   :  { %v689_v38 = vmul.f32 %v2053_v32, %v688_v34  ;;  %v1759_v22 = vor.u32 %v1986_v19, %v1756_v21 }
 0x19e   :  { %1299 = vmatpush.bf16.msra.mxu1 %v1771_v24  ;;  %v1748_v24 = vld [vmem:[#allocation6 + $0xc8] sm:$0xf0] }
 0x19f   :  { %v690_v43 = vmul.f32 0.5, %v689_v38  ;;  %v841_v38 = vrot.slane %v840_v31, 4  ;;  %v1751_v25 = vor.u32 %v1984_v23, %v1748_v24 }
 0x1a1   :  { %v691_v48 = vsub.f32 1.5, %v690_v43  ;;  %v1747_v43 = vor.u32 %v1985_v36, %v1746_v35  ;;  %v1724_v35 = vld [vmem:[#allocation6 + $0x98] sm:$0xf0] }
 0x1a2   :  { %1300 = vmatpush.bf16.msra.mxu1 %v1763_v27  ;;  %v1982_v27 = vld [vmem:[#allocation6 + $0xb4] sm:$0xf] }
 0x1a3   :  { %v692_v54 = vmul.f32 %v2053_v32, %v691_v48  ;;  %v842_v48 = vadd.f32 %v841_v38, %v840_v31  ;;  %v1743_v20 = vor.u32 %v1982_v27, %v1740_v29  ;;  %v1732_v31 = vld [vmem:[#allocation6 + $0xa8] sm:$0xf0]  ;;  %v1794_v27 = vld [vmem:[#allocation6 + $0x120] sm:$0xf]  ;;  %v1997_v29 = vld [vmem:[#allocation6 + $0x124] sm:$0xf0] }
 0x1a4   :  { %v1716_v38 = vld [vmem:[#allocation6 + $0x88] sm:$0xf0] }
 0x1a5   :  { %v696_v57 = vsel %vm695_vm10, %v2053_v32, %v692_v54  ;;  %v843_v55 = vrot.slane %v842_v48, 2 }
 0x1a6   :  { %2028 = vpush %v696_v57  ;;  %1301 = vmatpush.bf16.msra.mxu1 %v1755_v33  ;;  %v1731_v57 = vor.u32 %v1981_v51, %v1730_v50  ;;  %v1978_v33 = vld [vmem:[#allocation6 + $0x94] sm:$0xf]  ;;  %v1890_v50 = vld [vmem:[#allocation6 + $0x1e0] sm:$0xf]  ;;  %v2021_v51 = vld [vmem:[#allocation6 + $0x1e4] sm:$0xf0] }
 0x1a7   :  { %2030 = vpush %v742_v58  ;;  %v1722_v58 = vld [vmem:[#allocation6 + $0x90] sm:$0xf]  ;;  %v844_v15 = vadd.f32 %v843_v55, %v842_v48  ;;  %v1727_v36 = vor.u32 %v1978_v33, %v1724_v35  ;;  %v2005_v48 = vld [vmem:[#allocation6 + $0x164] sm:$0xf0] }
 0x1a8   :  { %2032 = vpush %v762_v60  ;;  %v1979_v60 = vld [vmem:[#allocation6 + $0x94] sm:$0xf0]  ;;  %v1827_v53 = vor.u32 %v2005_v48, %v1826_v47  ;;  %v1786_v33 = vld [vmem:[#allocation6 + $0x110] sm:$0xf]  ;;  %v2006_v48 = vld [vmem:[#allocation6 + $0x174] sm:$0xf] }
 0x1a9   :  { %v1723_v63 = vor.u32 %v1979_v60, %v1722_v58  ;;  %v845_v5 = vrot.slane %v844_v15, 1  ;;  %v2003_v58 = vld [vmem:[#allocation6 + $0x154] sm:$0xf0] }
 0x1aa   :  { %1302 = vmatpush.bf16.msra.mxu1 %v1747_v43  ;;  %v2007_v43 = vld [vmem:[#allocation6 + $0x174] sm:$0xf0] }
 0x1ab   :  { %v846_v10 = vadd.f32 %v845_v5, %v844_v15  ;;  %v1874_v5 = vld [vmem:[#allocation6 + $0x1c0] sm:$0xf] }
 0x1d7   :  { %s2029_s25 = spop %2028 }
 0x1d8   :  { %s2331_s26 = smul.f32 %s2029_s25, %s684_s23  ;;  %s2031_s27 = spop %2030 }
 0x1d9   :  { %s2333_s28 = smul.f32 0.00295858, %s2031_s27  ;;  %s2033_s29 = spop %2032 }
 0x1da   :  { %v699_v26 = vstv %s2331_s26  ;;  %s705_s30 = smul.f32 %s2331_s26, %s2327_s17 }
 0x1db   :  { %s766_s7 = smul.f32 %s2333_s28, %s2333_s28  ;;  %v880_v30 = vmul.f32 %v699_v26, %v2247_v1  ;;  %v1983_v1 = vld [vmem:[#allocation6 + $0xb4] sm:$0xf0] }
 0x1dc   :  { %s2340_s8 = ssub.f32 %s704_s24, %s705_s30  ;;  %s765_s9 = smul.f32 0.00295858, %s2033_s29  ;;  %v1739_v49 = vor.u32 %v1983_v1, %v1738_v46  ;;  %v2023_v1 = vld [vmem:[#allocation6 + $0x1f4] sm:$0xf0] }
 0x1de   :  { %v707_v32 = vstv %s2340_s8  ;;  %s767_s10 = ssub.f32 %s765_s9, %s766_s7  ;;  %1303 = vmatpush.bf16.msra.mxu1 %v1739_v49  ;;  %s1403_s7 = sshll.u32 %s2412_s6, 4  ;;  %s1404_s7 = int_to_ptr.hbm [resolvable:$true] %s1403_s7 }
 0x1df   :  { %v884_v34 = vadd.f32 %v880_v30, %v707_v32  ;;  %v1980_v30 = vld [vmem:[#allocation6 + $0xa4] sm:$0xf]  ;;  %v709_v15 = vsel %vm633_vm3, %v707_v32, 0.0 }
 0x1e0   :  { %s769_s11 = sadd.f32 1e-05, %s767_s10 }
 0x1e1   :  { %v888_v41 = vmax.f32 %v884_v34, 0.0  ;;  %v1735_v34 = vor.u32 %v1980_v30, %v1732_v31  ;;  %v1795_v30 = vor.u32 %v1997_v29, %v1794_v27  ;;  %v2013_v31 = vld [vmem:[#allocation6 + $0x1a4] sm:$0xf0]  ;;  %v1852_v27 = vld [vmem:[#allocation6 + $0x198] sm:$0xf0] }
 0x1e2   :  { %v770_v42 = vstv %s769_s11  ;;  %1304 = vmatpush.bf16.msra.mxu1 %v1731_v57  ;;  %v1818_v57 = vld [vmem:[#allocation6 + $0x150] sm:$0xf] }
 0x1e3   :  { %v892_v45 = vpack.c.bf16 %v888_v41, %v888_v41  ;;  %2054 = vrsqrt.f32 %v770_v42  ;;  %vm777_vm12 = vweird.f32 %v770_v42  ;;  %v1719_v41 = vor.u32 %v1976_v37, %v1716_v38  ;;  %v2011_v37 = vld [vmem:[#allocation6 + $0x194] sm:$0xf0] }
 0x1e5   :  { %1294 = vmatmul.bf16.vlgmr.msra.gmra.mxu3 %v892_v45 }
 0x1e6   :  { %1305 = vmatpush.bf16.msra.mxu1 %v1723_v63 }
 0x1e9   :  { %v2055_v54 = vpop.eup %2054 }
 0x1ea   :  { %v772_v56 = vmul.f32 %v2055_v54, %v770_v42  ;;  %vm778_vm11 = vweird.f32 %v2055_v54  ;;  %1306 = vmatpush.bf16.msra.mxu1 %v1715_v7  ;;  %v1834_v42 = vld [vmem:[#allocation6 + $0x170] sm:$0xf] }
 0x1eb   :  { %vm779_vm13 = vmor %vm777_vm12, %vm778_vm11  ;;  %v1835_v46 = vor.u32 %v2007_v43, %v1834_v42  ;;  %v1778_v42 = vld [vmem:[#allocation6 + $0x100] sm:$0xf]  ;;  %v1993_v43 = vld [vmem:[#allocation6 + $0x104] sm:$0xf0] }
 0x1ec   :  { %v773_v40 = vmul.f32 %v2055_v54, %v772_v56  ;;  %v1891_v56 = vor.u32 %v2021_v51, %v1890_v50  ;;  %v2022_v50 = vld [vmem:[#allocation6 + $0x1f4] sm:$0xf] }
 0x1ed   :  { %1312 = vmatpush.bf16.msra.mxu2 %v1835_v46  ;;  %v1779_v46 = vor.u32 %v1993_v43, %v1778_v42 }
 0x1ee   :  { %v774_v62 = vmul.f32 0.5, %v773_v40  ;;  %1351 = vmatpush.bf16.msrb.mxu1 %v1775_v13  ;;  %v1882_v40 = vld [vmem:[#allocation6 + $0x1d0] sm:$0xf]  ;;  %v2015_v13 = vld [vmem:[#allocation6 + $0x1b4] sm:$0xf0] }
 0x1ef   :  { %v1883_v0 = vor.u32 %v2019_v61, %v1882_v40  ;;  %v1867_v28 = vor.u32 %v2015_v13, %v1866_v12  ;;  %v1892_v40 = vld [vmem:[#allocation6 + $0x1e8] sm:$0xf0]  ;;  %v1868_v12 = vld [vmem:[#allocation6 + $0x1b8] sm:$0xf0]  ;;  %v1996_v13 = vld [vmem:[#allocation6 + $0x124] sm:$0xf] }
 0x1f0   :  { %v775_v3 = vsub.f32 1.5, %v774_v62 }
 0x1f1   :  { %1313 = vmatpush.bf16.msra.mxu2 %v1827_v53  ;;  %v1900_v53 = vld [vmem:[#allocation6 + $0x1f8] sm:$0xf0] }
 0x1f2   :  { %v776_v44 = vmul.f32 %v2055_v54, %v775_v3  ;;  %1352 = vmatpush.bf16.msrb.mxu1 %v1767_v17  ;;  %v2001_v3 = vld [vmem:[#allocation6 + $0x144] sm:$0xf0] }
 0x1f4   :  { %v780_v8 = vsel %vm779_vm13, %v2055_v54, %v776_v44  ;;  %v701_v54 = vsel %vm633_vm3, %v699_v26, 0.0  ;;  %v1819_v26 = vor.u32 %v2003_v58, %v1818_v57  ;;  %v2017_v44 = vld [vmem:[#allocation6 + $0x1c4] sm:$0xf0]  ;;  %v1828_v57 = vld [vmem:[#allocation6 + $0x168] sm:$0xf0] }
 0x1f5   :  { %2034 = vpush %v780_v8  ;;  %1346 = vmatmul.bf16.vlgmr.msrb.gmra.mxu3 %v892_v45  ;;  %v1898_v45 = vld [vmem:[#allocation6 + $0x1f0] sm:$0xf]  ;;  %v1811_v8 = vor.u32 %v2001_v3, %v1810_v2  ;;  %v2020_v58 = vld [vmem:[#allocation6 + $0x1e4] sm:$0xf]  ;;  %v1884_v2 = vld [vmem:[#allocation6 + $0x1d8] sm:$0xf0] }
 0x1f6   :  { %2036 = vpush %v826_v9  ;;  %1353 = vmatpush.bf16.msrb.mxu1 %v1759_v22  ;;  %v1899_v49 = vor.u32 %v2023_v1, %v1898_v45  ;;  %1314 = vmatpush.bf16.msra.mxu2 %v1819_v26  ;;  %v1842_v45 = vld [vmem:[#allocation6 + $0x180] sm:$0xf]  ;;  %v2009_v1 = vld [vmem:[#allocation6 + $0x184] sm:$0xf0]  ;;  %v1895_v61 = vor.u32 %v2020_v58, %v1892_v40  ;;  %v2002_v26 = vld [vmem:[#allocation6 + $0x154] sm:$0xf] }
 0x1f7   :  { %2038 = vpush %v846_v10  ;;  %v1875_v10 = vor.u32 %v2017_v44, %v1874_v5  ;;  %v1843_v47 = vor.u32 %v2009_v1, %v1842_v45  ;;  %v1812_v5 = vld [vmem:[#allocation6 + $0x148] sm:$0xf0]  ;;  %v2016_v44 = vld [vmem:[#allocation6 + $0x1c4] sm:$0xf] }
 0x1f8   :  { %1325 = vmatpush.bf16.msra.mxu0 %v1899_v49  ;;  %v1836_v49 = vld [vmem:[#allocation6 + $0x178] sm:$0xf0] }
 0x1f9   :  { %v1839_v51 = vor.u32 %v2006_v48, %v1836_v49 }
 0x1fa   :  { %1354 = vmatpush.bf16.msrb.mxu1 %v1751_v25  ;;  %1315 = vmatpush.bf16.msra.mxu2 %v1811_v8  ;;  %v1876_v8 = vld [vmem:[#allocation6 + $0x1c8] sm:$0xf0] }
 0x1fc   :  { %1326 = vmatpush.bf16.msra.mxu0 %v1891_v56  ;;  %v2004_v56 = vld [vmem:[#allocation6 + $0x164] sm:$0xf] }
 0x1fe   :  { %1355 = vmatpush.bf16.msrb.mxu1 %v1743_v20  ;;  %v1858_v20 = vld [vmem:[#allocation6 + $0x1a0] sm:$0xf] }
 0x1ff   :  { %v1859_v35 = vor.u32 %v2013_v31, %v1858_v20  ;;  %v1780_v31 = vld [vmem:[#allocation6 + $0x108] sm:$0xf0] }
 0x200   :  { %1327 = vmatpush.bf16.msra.mxu0 %v1883_v0 }
 0x202   :  { %1356 = vmatpush.bf16.msrb.mxu1 %v1735_v34  ;;  %v1995_v34 = vld [vmem:[#allocation6 + $0x114] sm:$0xf0] }
 0x203   :  { %v1787_v38 = vor.u32 %v1995_v34, %v1786_v33  ;;  %v2008_v33 = vld [vmem:[#allocation6 + $0x184] sm:$0xf]  ;;  %v1844_v34 = vld [vmem:[#allocation6 + $0x188] sm:$0xf0] }
 0x204   :  { %1328 = vmatpush.bf16.msra.mxu0 %v1875_v10  ;;  %v1804_v10 = vld [vmem:[#allocation6 + $0x138] sm:$0xf0] }
 0x206   :  { %1357 = vmatpush.bf16.msrb.mxu1 %v1727_v36  ;;  %v1850_v36 = vld [vmem:[#allocation6 + $0x190] sm:$0xf] }
 0x208   :  { %1329 = vmatpush.bf16.msra.mxu0 %v1867_v28  ;;  %v2012_v28 = vld [vmem:[#allocation6 + $0x1a4] sm:$0xf] }
 0x20a   :  { %1358 = vmatpush.bf16.msrb.mxu1 %v1719_v41  ;;  %v1851_v41 = vor.u32 %v2011_v37, %v1850_v36  ;;  %v1847_v37 = vor.u32 %v2008_v33, %v1844_v34 }
 0x20c   :  { %1330 = vmatpush.bf16.msra.mxu0 %v1859_v35 }
 0x210   :  { %1331 = vmatpush.bf16.msra.mxu0 %v1851_v41 }
 0x214   :  { %1332 = vmatpush.bf16.msra.mxu0 %v1843_v47 }
 0x226   :  { %s2035_s13 = spop %2034 }
 0x227   :  { %s2350_s14 = smul.f32 %s2035_s13, %s1644_s1  ;;  %s2037_s15 = spop %2036 }
 0x228   :  { %s2352_s2 = smul.f32 0.00295858, %s2037_s15  ;;  %s2039_s16 = spop %2038 }
 0x229   :  { %v783_v55 = vstv %s2350_s14  ;;  %s789_s4 = smul.f32 %s2350_s14, %s2333_s28 }
 0x22a   :  { %v785_v60 = vsel %vm713_vm4, %v783_v55, %v701_v54  ;;  %s850_s5 = smul.f32 %s2352_s2, %s2352_s2  ;;  %v1903_v54 = vor.u32 %v2022_v50, %v1900_v53 }
 0x22b   :  { %s2368_s0 = ssub.f32 %s2348_s12, %s789_s4  ;;  %s849_s17 = smul.f32 0.00295858, %s2039_s16  ;;  %v881_v63 = vmul.f32 %v785_v60, %v2254_v39  ;;  %v1802_v39 = vld [vmem:[#allocation6 + $0x130] sm:$0xf]  ;;  %v1831_v60 = vor.u32 %v2004_v56, %v1828_v57 }
 0x22c   :  { %v1803_v16 = vor.u32 %v1999_v11, %v1802_v39  ;;  %1377 = vmatpush.bf16.msrb.mxu0 %v1903_v54  ;;  %v2014_v39 = vld [vmem:[#allocation6 + $0x1b4] sm:$0xf] }
 0x22d   :  { %v791_v62 = vstv %s2368_s0  ;;  %s851_s18 = ssub.f32 %s849_s17, %s850_s5 }
 0x22e   :  { %v793_v4 = vsel %vm713_vm4, %v791_v62, %v709_v15  ;;  %1316 = vmatpush.bf16.msra.mxu2 %v1803_v16  ;;  %v1820_v15 = vld [vmem:[#allocation6 + $0x158] sm:$0xf0]  ;;  %v1871_v16 = vor.u32 %v2014_v39, %v1868_v12 }
 0x22f   :  { %v885_v7 = vadd.f32 %v881_v63, %v793_v4  ;;  %s853_s19 = sadd.f32 1e-05, %s851_s18  ;;  %v2018_v63 = vld [vmem:[#allocation6 + $0x1d4] sm:$0xf]  ;;  %v1823_v0 = vor.u32 %v2002_v26, %v1820_v15  ;;  %v2000_v4 = vld [vmem:[#allocation6 + $0x144] sm:$0xf] }
 0x230   :  { %1378 = vmatpush.bf16.msrb.mxu0 %v1895_v61  ;;  %v1887_v3 = vor.u32 %v2018_v63, %v1884_v2 }
 0x231   :  { %v854_v9 = vstv %s853_s19  ;;  %v889_v32 = vmax.f32 %v885_v7, 0.0  ;;  %v1815_v7 = vor.u32 %v2000_v4, %v1812_v5 }
 0x232   :  { %2056 = vrsqrt.f32 %v854_v9  ;;  %vm861_vm15 = vweird.f32 %v854_v9  ;;  %1317 = vmatpush.bf16.msra.mxu2 %v1795_v30  ;;  %v1992_v30 = vld [vmem:[#allocation6 + $0x104] sm:$0xf] }
 0x233   :  { %v893_v14 = vpack.c.bf16 %v889_v32, %v889_v32  ;;  %v1998_v32 = vld [vmem:[#allocation6 + $0x134] sm:$0xf]  ;;  %v1783_v35 = vor.u32 %v1992_v30, %v1780_v31 }
 0x234   :  { %1379 = vmatpush.bf16.msrb.mxu0 %v1887_v3  ;;  %v1807_v11 = vor.u32 %v1998_v32, %v1804_v10 }
 0x235   :  { %1307 = vmatmul.bf16.vlgmr.msra.gmra.mxu1 %v893_v14 }
 0x236   :  { %1318 = vmatpush.bf16.msra.mxu2 %v1787_v38  ;;  %v786_v38 = vsel %vm718_vm5, %v783_v55, 0.0 }
 0x238   :  { %v2057_v17 = vpop.eup %2056 }
 0x239   :  { %v856_v19 = vmul.f32 %v2057_v17, %v854_v9  ;;  %vm862_vm14 = vweird.f32 %v2057_v17  ;;  %v1879_v9 = vor.u32 %v2016_v44, %v1876_v8 }
 0x23a   :  { %vm863_vm0 = vmor %vm861_vm15, %vm862_vm14  ;;  %1319 = vmatpush.bf16.msra.mxu2 %v1779_v46  ;;  %v794_v46 = vsel %vm718_vm5, %v791_v62, 0.0 }
 0x23b   :  { %v857_v21 = vmul.f32 %v2057_v17, %v856_v19  ;;  %1380 = vmatpush.bf16.msrb.mxu0 %v1879_v9 }
 0x23d   :  { %v858_v22 = vmul.f32 0.5, %v857_v21 }
 0x23e   :  { %1364 = vmatpush.bf16.msrb.mxu2 %v1839_v51 }
 0x23f   :  { %v859_v23 = vsub.f32 1.5, %v858_v22  ;;  %1381 = vmatpush.bf16.msrb.mxu0 %v1871_v16 }
 0x241   :  { %v860_v24 = vmul.f32 %v2057_v17, %v859_v23  ;;  %v1994_v23 = vld [vmem:[#allocation6 + $0x114] sm:$0xf] }
 0x242   :  { %1365 = vmatpush.bf16.msrb.mxu2 %v1831_v60 }
 0x243   :  { %v864_v25 = vsel %vm863_vm0, %v2057_v17, %v860_v24  ;;  %v1860_v17 = vld [vmem:[#allocation6 + $0x1a8] sm:$0xf0]  ;;  %v1788_v24 = vld [vmem:[#allocation6 + $0x118] sm:$0xf0] }
 0x244   :  { %2040 = vpush %v864_v25  ;;  %v1863_v22 = vor.u32 %v2012_v28, %v1860_v17  ;;  %v2010_v25 = vld [vmem:[#allocation6 + $0x194] sm:$0xf]  ;;  %v1791_v29 = vor.u32 %v1994_v23, %v1788_v24 }
 0x245   :  { %1359 = vmatmul.bf16.vlgmr.msrb.gmra.mxu1 %v893_v14  ;;  %v1796_v14 = vld [vmem:[#allocation6 + $0x128] sm:$0xf0]  ;;  %v1855_v20 = vor.u32 %v2010_v25, %v1852_v27 }
 0x246   :  { %1366 = vmatpush.bf16.msrb.mxu2 %v1823_v0  ;;  %v1799_v19 = vor.u32 %v1996_v13, %v1796_v14  ;;  %1382 = vmatpush.bf16.msrb.mxu0 %v1863_v22 }
 0x24a   :  { %1367 = vmatpush.bf16.msrb.mxu2 %v1815_v7  ;;  %1383 = vmatpush.bf16.msrb.mxu0 %v1855_v20 }
 0x24e   :  { %1368 = vmatpush.bf16.msrb.mxu2 %v1807_v11  ;;  %1384 = vmatpush.bf16.msrb.mxu0 %v1847_v37 }
 0x252   :  { %1369 = vmatpush.bf16.msrb.mxu2 %v1799_v19 }
 0x256   :  { %1370 = vmatpush.bf16.msrb.mxu2 %v1791_v29 }
 0x25a   :  { %1371 = vmatpush.bf16.msrb.mxu2 %v1783_v35 }
 0x268   :  { %v1295_v21 = vpop.f32.mrf.mxu3 }
 0x270   :  { %v1297_v36 = vpop.f32.mrf.mxu3 }
 0x275   :  { %s2041_s22 = spop %2040 }
 0x276   :  { %s866_s23 = smul.f32 %s2041_s22, %s1646_s20 }
 0x278   :  { %v867_v41 = vstv %s866_s23  ;;  %s873_s24 = smul.f32 %s866_s23, %s2352_s2  ;;  %v1347_v42 = vpop.f32.mrf.mxu3 }
 0x279   :  { %v870_v43 = vsel %vm798_vm6, %v867_v41, %v786_v38  ;;  %v871_v45 = vsel %vm803_vm7, %v867_v41, 0.0 }
 0x27a   :  { %s874_s25 = ssub.f32 %s1647_s21, %s873_s24  ;;  %v882_v47 = vmul.f32 %v870_v43, %v2278_v52  ;;  %v883_v48 = vmul.f32 %v871_v45, %v2284_v59  ;;  %v960_v52 = vld [vmem:[%s2409_s3] sm:$0x3]  ;;  %s2173_s3 = smov [#allocation11]  }
 0x27b   :  { %v962_v59 = vperm.slane %v960_v52, 0  ;;  %v963_v40 = vperm.slane %v960_v52, 1  ;;  %s1401_s28 = sshll.u32 %s2173_s3, 4  ;;  %s1402_s28 = int_to_ptr.vmem [resolvable:$true] %s1401_s28 }
 0x27c   :  { %v875_v1 = vstv %s874_s25 }
 0x27d   :  { %v878_v55 = vsel %vm798_vm6, %v875_v1, %v794_v46  ;;  %v879_v49 = vsel %vm803_vm7, %v875_v1, 0.0  ;;  %v1296_v6 = vadd.f32 %v1295_v21, %v962_v59  ;;  %v1348_v61 = vadd.f32 %v1347_v42, %v963_v40 }
 0x27e   :  { %v886_v50 = vadd.f32 %v882_v47, %v878_v55  ;;  %v887_v51 = vadd.f32 %v883_v48, %v879_v49 }
 0x280   :  { %v891_v53 = vmax.f32 %v887_v51, 0.0  ;;  %v890_v54 = vmax.f32 %v886_v50, 0.0  ;;  %v1349_v56 = vpop.f32.mrf.mxu3 }
 0x282   :  { %v894_v57 = vpack.c.bf16 %v890_v54, %v890_v54  ;;  %v895_v58 = vpack.c.bf16 %v891_v53, %v891_v53 }
 0x284   :  { %1320 = vmatmul.bf16.vlgmr.msra.gmra.mxu2 %v894_v57  ;;  %1333 = vmatmul.bf16.vlgmr.msra.gmra.mxu0 %v895_v58 }
 0x294   :  { %1372 = vmatmul.bf16.vlgmr.msrb.gmra.mxu2 %v894_v57  ;;  %1385 = vmatmul.bf16.vlgmr.msrb.gmra.mxu0 %v895_v58 }
 0x2b2   :  { %v1308_v62 = vpop.f32.mrf.mxu1 }
 0x2b3   :  { %v1309_v18 = vadd.f32 %v1308_v62, %v1296_v6 }
 0x2ba   :  { %v1310_v60 = vpop.f32.mrf.mxu1 }
 0x2c2   :  { %v1360_v26 = vpop.f32.mrf.mxu1 }
 0x2c3   :  { %v1361_v15 = vadd.f32 %v1360_v26, %v1348_v61 }
 0x2ca   :  { %v1362_v63 = vpop.f32.mrf.mxu1 }
 0x301   :  { %v1334_v0 = vpop.f32.mrf.mxu0 }
 0x307   :  { %v1321_v2 = vpop.f32.mrf.mxu2 }
 0x308   :  { %v1322_v7 = vadd.f32 %v1321_v2, %v1309_v18 }
 0x309   :  { %v1336_v3 = vpop.f32.mrf.mxu0 }
 0x30a   :  { %v1335_v10 = vadd.f32 %v1334_v0, %v1322_v7 }
 0x30f   :  { %v1323_v4 = vpop.f32.mrf.mxu2 }
 0x311   :  { %v1386_v5 = vpop.f32.mrf.mxu0 }
 0x317   :  { %v1373_v44 = vpop.f32.mrf.mxu2 }
 0x318   :  { %v1374_v8 = vadd.f32 %v1373_v44, %v1361_v15 }
 0x319   :  { %v1388_v9 = vpop.f32.mrf.mxu0 }
 0x31a   :  { %v1387_v32 = vadd.f32 %v1386_v5, %v1374_v8 }
 0x31c   :  { %v1392_v39 = vrot.slane %v1387_v32, 6 }
 0x31e   :  { %v1393_v11 = vsel %vm562_vm2, %v1335_v10, %v1392_v39 }
 0x31f   :  { %v1375_v12 = vpop.f32.mrf.mxu2  ;;  %1395 = vst [vmem:[#allocation11] sm:$0xf] %v1393_v11 }
 0x320   :  { %1406 = dma.vmem_to_hbm [thread:$0]  %s1402_s28, 64, %s1404_s7, [#allocation4]  }
 0x321   :  { %2162 = dma.done.wait [#allocation4], 64  }
 0x322   :  { %2163 = vsyncadd [#allocation4], 4294967232 }
 0x323   :  { %1411 = vsyncpa [#allocation3], 1 }
 0x324   :  { %1412 = vsyncpa [#allocation7], 1 }
 0x325   :  { %1413 = vsyncpa [#allocation4], 1 }
 0x326   :  { %1414 = vsyncpa [#allocation5], 1 }
 0x327   :  { %1415 = vsyncpa [#allocation10], 1 }

</bundles_post_ra>
